<compile_context>
chip_gen: v5e
topology: v5e:2x2
jax: 0.10.0
libtpu: 0.0.40
codegen_flags: <defaults>
</compile_context>

<pallas_src>
import math

import jax
import jax.numpy as jnp
from jax.experimental import pallas as pl
from jax.experimental.pallas import tpu as pltpu

# ----------------------------- tiny BERT config -----------------------------
HIDDEN = 32
NUM_HEADS = 2
HEAD_DIM = HIDDEN // NUM_HEADS
INTERMEDIATE = 64
NUM_LAYERS = 2
VOCAB = 100
MAX_POS = 16
TYPE_VOCAB = 2
LN_EPS = 1e-12
NEG_INF = -1e9


# --------------------------- in-kernel helper math ---------------------------
def _layernorm(x, g, b):
    mu = jnp.mean(x, axis=-1, keepdims=True)
    var = jnp.mean(jnp.square(x - mu), axis=-1, keepdims=True)
    inv = jax.lax.rsqrt(var + LN_EPS)
    return (x - mu) * inv * g + b


def _gelu(x):
    # TODO(synk): tanh-approx GELU; reference BERT uses exact erf-GELU.
    return 0.5 * x * (1.0 + jnp.tanh(0.7978845608028654 * (x + 0.044715 * x * x * x)))


def _ce_from_column(col, tgt):
    """Cross-entropy of one (S, 1) logit column vs. a scalar int target."""
    mx = jnp.max(col, axis=0, keepdims=True)                       # (1, 1)
    lse = jnp.log(jnp.sum(jnp.exp(col - mx), axis=0, keepdims=True)) + mx
    idx = jax.lax.broadcasted_iota(jnp.int32, col.shape, 0)
    picked = jnp.sum(jnp.where(idx == tgt, col, 0.0), axis=0, keepdims=True)
    return lse - picked                                            # (1, 1)


# ------------------------------ the fused kernel ------------------------------
def _bert_fused_kernel(
    # scalar-prefetch operands (SMEM), each shape (B,)
    start_ref, end_ref,
    # tensor operands
    emb_ref, mask_ref, eg_ref, eb_ref,
    wqkv_ref, bqkv_ref, wo_ref, bo_ref, ln1g_ref, ln1b_ref,
    w1_ref, b1_ref, w2_ref, b2_ref, ln2g_ref, ln2b_ref,
    hw_ref, hb_ref,
    # outputs
    logits_ref, loss_ref,
):
    b = pl.program_id(0)
    bf16 = jnp.bfloat16

    # Embedding layernorm (f32).
    x = _layernorm(emb_ref[0], eg_ref[...], eb_ref[...])           # (S, H)

    # Additive attention mask built in-kernel from the raw int mask.
    neg_mask = (1.0 - mask_ref[0].astype(jnp.float32)) * NEG_INF   # (1, S)

    for l in range(NUM_LAYERS):
        # ---- fused QKV projection: one (S,H)x(H,3H) MXU matmul ----
        qkv = jnp.dot(x.astype(bf16), wqkv_ref[l],
                      preferred_element_type=jnp.float32) + bqkv_ref[l]   # (S, 3H)

        # ---- per-head attention, fully unrolled in this kernel ----
        ctx_heads = []
        for h in range(NUM_HEADS):
            q = qkv[:, h * HEAD_DIM:(h + 1) * HEAD_DIM]            # scale folded into wq
            k = qkv[:, HIDDEN + h * HEAD_DIM:HIDDEN + (h + 1) * HEAD_DIM]
            v = qkv[:, 2 * HIDDEN + h * HEAD_DIM:2 * HIDDEN + (h + 1) * HEAD_DIM]
            s = jax.lax.dot_general(q.astype(bf16), k.astype(bf16),
                                    (((1,), (1,)), ((), ())),
                                    preferred_element_type=jnp.float32)   # (S, S)
            s = s + neg_mask
            s = s - jnp.max(s, axis=-1, keepdims=True)
            p = jnp.exp(s)
            p = p * pl.reciprocal(jnp.sum(p, axis=-1, keepdims=True), approx=True)
            ctx_heads.append(jnp.dot(p.astype(bf16), v.astype(bf16),
                                     preferred_element_type=jnp.float32))  # (S, Dh)
        ctx = jnp.concatenate(ctx_heads, axis=-1)                  # (S, H)

        attn_out = jnp.dot(ctx.astype(bf16), wo_ref[l],
                           preferred_element_type=jnp.float32) + bo_ref[l]
        x = _layernorm(attn_out + x, ln1g_ref[l], ln1b_ref[l])

        inter = _gelu(jnp.dot(x.astype(bf16), w1_ref[l],
                              preferred_element_type=jnp.float32) + b1_ref[l])
        ffn = jnp.dot(inter.astype(bf16), w2_ref[l],
                      preferred_element_type=jnp.float32) + b2_ref[l]
        x = _layernorm(ffn + x, ln2g_ref[l], ln2b_ref[l])

    # ---- QA head + per-batch cross-entropy, fused ----
    logits = jnp.dot(x.astype(bf16), hw_ref[...],
                     preferred_element_type=jnp.float32) + hb_ref[...]    # (S, 2)
    logits_ref[0] = logits

    ce_start = _ce_from_column(logits[:, 0:1], start_ref[b])
    ce_end = _ce_from_column(logits[:, 1:2], end_ref[b])
    loss_ref[0] = ce_start + ce_end                                # (1, 1)


# ------------------------------- forward (glue) -------------------------------
def _const_spec(shape):
    nd = len(shape)
    return pl.BlockSpec(shape, lambda b, s_ref, e_ref, _nd=nd: (0,) * _nd)


def bert_ad_forward(params, ids, mask, token_type, start, end):
    B, S = ids.shape
    # Embedding gathers stay in JAX (no clean Pallas gather for tiny tables).
    emb = (params["word_emb"][ids]
           + params["pos_emb"][:S][None, :, :]
           + params["type_emb"][token_type])                       # (B, S, H) f32
    mask3 = mask.astype(jnp.int32).reshape(B, 1, S)

    grid_spec = pltpu.PrefetchScalarGridSpec(
        num_scalar_prefetch=2,
        grid=(B,),
        in_specs=[
            pl.BlockSpec((1, S, HIDDEN), lambda b, s_ref, e_ref: (b, 0, 0)),  # emb
            pl.BlockSpec((1, 1, S), lambda b, s_ref, e_ref: (b, 0, 0)),       # mask
            _const_spec((1, HIDDEN)), _const_spec((1, HIDDEN)),               # emb LN
            _const_spec((NUM_LAYERS, HIDDEN, 3 * HIDDEN)),                    # wqkv
            _const_spec((NUM_LAYERS, 1, 3 * HIDDEN)),                         # bqkv
            _const_spec((NUM_LAYERS, HIDDEN, HIDDEN)),                        # wo
            _const_spec((NUM_LAYERS, 1, HIDDEN)),                             # bo
            _const_spec((NUM_LAYERS, 1, HIDDEN)),                             # ln1_g
            _const_spec((NUM_LAYERS, 1, HIDDEN)),                             # ln1_b
            _const_spec((NUM_LAYERS, HIDDEN, INTERMEDIATE)),                  # w1
            _const_spec((NUM_LAYERS, 1, INTERMEDIATE)),                       # b1
            _const_spec((NUM_LAYERS, INTERMEDIATE, HIDDEN)),                  # w2
            _const_spec((NUM_LAYERS, 1, HIDDEN)),                             # b2
            _const_spec((NUM_LAYERS, 1, HIDDEN)),                             # ln2_g
            _const_spec((NUM_LAYERS, 1, HIDDEN)),                             # ln2_b
            _const_spec((HIDDEN, 2)), _const_spec((1, 2)),                    # head
        ],
        out_specs=[
            pl.BlockSpec((1, S, 2), lambda b, s_ref, e_ref: (b, 0, 0)),
            pl.BlockSpec((1, 1, 1), lambda b, s_ref, e_ref: (b, 0, 0)),
        ],
    )

    logits, loss_parts = pl.pallas_call(
        _bert_fused_kernel,
        out_shape=(jax.ShapeDtypeStruct((B, S, 2), jnp.float32),
                   jax.ShapeDtypeStruct((B, 1, 1), jnp.float32)),
        grid_spec=grid_spec,
        compiler_params=pltpu.CompilerParams(dimension_semantics=("parallel",)),
    )(start.astype(jnp.int32), end.astype(jnp.int32),
      emb, mask3, params["emb_ln_g"], params["emb_ln_b"],
      params["wqkv"], params["bqkv"], params["wo"], params["bo"],
      params["ln1_g"], params["ln1_b"], params["w1"], params["b1"],
      params["w2"], params["b2"], params["ln2_g"], params["ln2_b"],
      params["head_w"], params["head_b"])

    start_logits = logits[:, :, 0]                                  # (B, S)
    end_logits = logits[:, :, 1]                                    # (B, S)
    # CrossEntropyLoss(reduction='mean') over batch for start and end, summed:
    # mean_b(ce_start_b + ce_end_b) == mean(ce_start) + mean(ce_end).
    loss = jnp.mean(loss_parts)
    return loss, start_logits, end_logits


# -------------------------------- param init ----------------------------------
def init_params(key):
    # TODO(synk): pretrained bert-base weights replaced by synthetic init;
    #             dropout omitted (eval semantics).
    keys = iter(jax.random.split(key, 64))

    def normal(shape):
        return 0.02 * jax.random.normal(next(keys), shape, dtype=jnp.float32)

    zeros = lambda shape: jnp.zeros(shape, jnp.float32)
    ones = lambda shape: jnp.ones(shape, jnp.float32)
    scale = 1.0 / math.sqrt(HEAD_DIM)

    wqkv, bqkv, wo, bo = [], [], [], []
    ln1g, ln1b, w1, b1, w2, b2, ln2g, ln2b = ([] for _ in range(8))
    for _ in range(NUM_LAYERS):
        wq, wk, wv = (normal((HIDDEN, HIDDEN)) for _ in range(3))
        # Fold the 1/sqrt(head_dim) attention scale into the Q projection.
        wqkv.append(jnp.concatenate([wq * scale, wk, wv], axis=1))      # (H, 3H)
        bqkv.append(zeros((1, 3 * HIDDEN)))
        wo.append(normal((HIDDEN, HIDDEN))); bo.append(zeros((1, HIDDEN)))
        ln1g.append(ones((1, HIDDEN))); ln1b.append(zeros((1, HIDDEN)))
        w1.append(normal((HIDDEN, INTERMEDIATE))); b1.append(zeros((1, INTERMEDIATE)))
        w2.append(normal((INTERMEDIATE, HIDDEN))); b2.append(zeros((1, HIDDEN)))
        ln2g.append(ones((1, HIDDEN))); ln2b.append(zeros((1, HIDDEN)))

    stack = lambda xs, dt=jnp.float32: jnp.stack(xs).astype(dt)
    return {
        "word_emb": normal((VOCAB, HIDDEN)),
        "pos_emb": normal((MAX_POS, HIDDEN)),
        "type_emb": normal((TYPE_VOCAB, HIDDEN)),
        "emb_ln_g": ones((1, HIDDEN)), "emb_ln_b": zeros((1, HIDDEN)),
        # matmul weights stored in bf16 (native MXU dtype); LN/bias in f32
        "wqkv": stack(wqkv, jnp.bfloat16), "bqkv": stack(bqkv),
        "wo": stack(wo, jnp.bfloat16), "bo": stack(bo),
        "ln1_g": stack(ln1g), "ln1_b": stack(ln1b),
        "w1": stack(w1, jnp.bfloat16), "b1": stack(b1),
        "w2": stack(w2, jnp.bfloat16), "b2": stack(b2),
        "ln2_g": stack(ln2g), "ln2_b": stack(ln2b),
        "head_w": normal((HIDDEN, 2)).astype(jnp.bfloat16),
        "head_b": zeros((1, 2)),
    }


# ----------------------------------- main --------------------------------------
if __name__ == "__main__":
    key = jax.random.PRNGKey(0)
    k_param, k_ids, k_start, k_end = jax.random.split(key, 4)

    B, S = 2, 8
    params = init_params(k_param)

    ids = jax.random.randint(k_ids, (B, S), 0, VOCAB, dtype=jnp.int32)
    mask = jnp.ones((B, S), dtype=jnp.int32).at[1, 6:].set(0)
    token_type = jnp.zeros((B, S), dtype=jnp.int32).at[:, 4:].set(1)
    start = jax.random.randint(k_start, (B,), 0, S, dtype=jnp.int32)
    end = jax.random.randint(k_end, (B,), 0, S, dtype=jnp.int32)

    fwd = jax.jit(bert_ad_forward)
    loss, start_logits, end_logits = fwd(params, ids, mask, token_type, start, end)

    jax.block_until_ready((loss, start_logits, end_logits))
    assert start_logits.shape == (B, S) and end_logits.shape == (B, S)
    assert loss.shape == () and jnp.isfinite(loss)
    print("KERNEL_OK")
</pallas_src>

<mosaic_0001>
module attributes {stable_mosaic.version = 11 : i64} {
  func.func @_bert_fused_kernel(%arg0: i32, %arg1: memref<2xi32, #tpu.memory_space<smem>>, %arg2: memref<2xi32, #tpu.memory_space<smem>>, %arg3: memref<1x8x32xf32, #tpu.memory_space<vmem>>, %arg4: memref<1x1x8xi32, #tpu.memory_space<vmem>>, %arg5: memref<1x32xf32, #tpu.memory_space<vmem>>, %arg6: memref<1x32xf32, #tpu.memory_space<vmem>>, %arg7: memref<2x32x96xbf16, #tpu.memory_space<vmem>>, %arg8: memref<2x1x96xf32, #tpu.memory_space<vmem>>, %arg9: memref<2x32x32xbf16, #tpu.memory_space<vmem>>, %arg10: memref<2x1x32xf32, #tpu.memory_space<vmem>>, %arg11: memref<2x1x32xf32, #tpu.memory_space<vmem>>, %arg12: memref<2x1x32xf32, #tpu.memory_space<vmem>>, %arg13: memref<2x32x64xbf16, #tpu.memory_space<vmem>>, %arg14: memref<2x1x64xf32, #tpu.memory_space<vmem>>, %arg15: memref<2x64x32xbf16, #tpu.memory_space<vmem>>, %arg16: memref<2x1x32xf32, #tpu.memory_space<vmem>>, %arg17: memref<2x1x32xf32, #tpu.memory_space<vmem>>, %arg18: memref<2x1x32xf32, #tpu.memory_space<vmem>>, %arg19: memref<32x2xbf16, #tpu.memory_space<vmem>>, %arg20: memref<1x2xf32, #tpu.memory_space<vmem>>, %arg21: memref<1x8x2xf32, #tpu.memory_space<vmem>>, %arg22: memref<1x1x1xf32, #tpu.memory_space<vmem>>) attributes {dimension_semantics = [#tpu.dimension_semantics<parallel>], iteration_bounds = array<i64: 2>, scalar_prefetch = 2 : i64, scratch_operands = 0 : i64, tpu.core_type = #tpu.core_type<tc>, window_params = [{transform_indices = @transform_0, window_bounds = array<i64: 1, 8, 32>}, {transform_indices = @transform_1, window_bounds = array<i64: 1, 1, 8>}, {pipeline_mode = #tpu.pipeline_mode<synchronous>, transform_indices = @transform_2, window_bounds = array<i64: 1, 32>}, {pipeline_mode = #tpu.pipeline_mode<synchronous>, transform_indices = @transform_3, window_bounds = array<i64: 1, 32>}, {pipeline_mode = #tpu.pipeline_mode<synchronous>, transform_indices = @transform_4, window_bounds = array<i64: 2, 32, 96>}, {pipeline_mode = #tpu.pipeline_mode<synchronous>, transform_indices = @transform_5, window_bounds = array<i64: 2, 1, 96>}, {pipeline_mode = #tpu.pipeline_mode<synchronous>, transform_indices = @transform_6, window_bounds = array<i64: 2, 32, 32>}, {pipeline_mode = #tpu.pipeline_mode<synchronous>, transform_indices = @transform_7, window_bounds = array<i64: 2, 1, 32>}, {pipeline_mode = #tpu.pipeline_mode<synchronous>, transform_indices = @transform_8, window_bounds = array<i64: 2, 1, 32>}, {pipeline_mode = #tpu.pipeline_mode<synchronous>, transform_indices = @transform_9, window_bounds = array<i64: 2, 1, 32>}, {pipeline_mode = #tpu.pipeline_mode<synchronous>, transform_indices = @transform_10, window_bounds = array<i64: 2, 32, 64>}, {pipeline_mode = #tpu.pipeline_mode<synchronous>, transform_indices = @transform_11, window_bounds = array<i64: 2, 1, 64>}, {pipeline_mode = #tpu.pipeline_mode<synchronous>, transform_indices = @transform_12, window_bounds = array<i64: 2, 64, 32>}, {pipeline_mode = #tpu.pipeline_mode<synchronous>, transform_indices = @transform_13, window_bounds = array<i64: 2, 1, 32>}, {pipeline_mode = #tpu.pipeline_mode<synchronous>, transform_indices = @transform_14, window_bounds = array<i64: 2, 1, 32>}, {pipeline_mode = #tpu.pipeline_mode<synchronous>, transform_indices = @transform_15, window_bounds = array<i64: 2, 1, 32>}, {pipeline_mode = #tpu.pipeline_mode<synchronous>, transform_indices = @transform_16, window_bounds = array<i64: 32, 2>}, {pipeline_mode = #tpu.pipeline_mode<synchronous>, transform_indices = @transform_17, window_bounds = array<i64: 1, 2>}, {transform_indices = @transform_18, window_bounds = array<i64: 1, 8, 2>}, {transform_indices = @transform_19, window_bounds = array<i64: 1, 1, 1>}]} {
    %c0 = arith.constant 0 : index
    %c0_0 = arith.constant 0 : index
    %c0_1 = arith.constant 0 : index
    %0 = vector.load %arg3[%c0, %c0_0, %c0_1] : memref<1x8x32xf32, #tpu.memory_space<vmem>>, vector<1x8x32xf32>
    %1 = vector.shape_cast %0 : vector<1x8x32xf32> to vector<8x32xf32>
    %c0_2 = arith.constant 0 : index
    %c0_3 = arith.constant 0 : index
    %2 = vector.load %arg5[%c0_2, %c0_3] : memref<1x32xf32, #tpu.memory_space<vmem>>, vector<1x32xf32>
    %c0_4 = arith.constant 0 : index
    %c0_5 = arith.constant 0 : index
    %3 = vector.load %arg6[%c0_4, %c0_5] : memref<1x32xf32, #tpu.memory_space<vmem>>, vector<1x32xf32>
    %cst = arith.constant dense<0.000000e+00> : vector<8xf32>
    %4 = vector.multi_reduction <add>, %1, %cst [1] : vector<8x32xf32> to vector<8xf32>
    %5 = vector.shape_cast %4 : vector<8xf32> to vector<8x1xf32>
    %cst_6 = arith.constant 3.200000e+01 : f32
    %6 = vector.broadcast %cst_6 : f32 to vector<8x1xf32>
    %7 = arith.divf %5, %6 : vector<8x1xf32>
    %8 = vector.broadcast %7 : vector<8x1xf32> to vector<8x32xf32>
    %9 = arith.subf %1, %8 : vector<8x32xf32>
    %10 = arith.mulf %9, %9 : vector<8x32xf32>
    %cst_7 = arith.constant dense<0.000000e+00> : vector<8xf32>
    %11 = vector.multi_reduction <add>, %10, %cst_7 [1] : vector<8x32xf32> to vector<8xf32>
    %12 = vector.shape_cast %11 : vector<8xf32> to vector<8x1xf32>
    %cst_8 = arith.constant 3.200000e+01 : f32
    %13 = vector.broadcast %cst_8 : f32 to vector<8x1xf32>
    %14 = arith.divf %12, %13 : vector<8x1xf32>
    %cst_9 = arith.constant 9.99999996E-13 : f32
    %15 = vector.broadcast %cst_9 : f32 to vector<8x1xf32>
    %16 = arith.addf %14, %15 : vector<8x1xf32>
    %17 = math.rsqrt %16 : vector<8x1xf32>
    %18 = vector.broadcast %7 : vector<8x1xf32> to vector<8x32xf32>
    %19 = arith.subf %1, %18 : vector<8x32xf32>
    %20 = vector.broadcast %17 : vector<8x1xf32> to vector<8x32xf32>
    %21 = arith.mulf %19, %20 : vector<8x32xf32>
    %22 = vector.broadcast %2 : vector<1x32xf32> to vector<8x32xf32>
    %23 = arith.mulf %21, %22 : vector<8x32xf32>
    %24 = vector.broadcast %3 : vector<1x32xf32> to vector<8x32xf32>
    %25 = arith.addf %23, %24 : vector<8x32xf32>
    %c0_10 = arith.constant 0 : index
    %c0_11 = arith.constant 0 : index
    %c0_12 = arith.constant 0 : index
    %26 = vector.load %arg4[%c0_10, %c0_11, %c0_12] : memref<1x1x8xi32, #tpu.memory_space<vmem>>, vector<1x1x8xi32>
    %27 = vector.shape_cast %26 : vector<1x1x8xi32> to vector<1x8xi32>
    %28 = arith.sitofp %27 : vector<1x8xi32> to vector<1x8xf32>
    %cst_13 = arith.constant 1.000000e+00 : f32
    %29 = vector.broadcast %cst_13 : f32 to vector<1x8xf32>
    %30 = arith.subf %29, %28 : vector<1x8xf32>
    %cst_14 = arith.constant -1.000000e+09 : f32
    %31 = vector.broadcast %cst_14 : f32 to vector<1x8xf32>
    %32 = arith.mulf %30, %31 : vector<1x8xf32>
    %33 = arith.truncf %25 : vector<8x32xf32> to vector<8x32xbf16>
    %c0_15 = arith.constant 0 : index
    %c0_16 = arith.constant 0 : index
    %c0_17 = arith.constant 0 : index
    %34 = vector.load %arg7[%c0_15, %c0_16, %c0_17] : memref<2x32x96xbf16, #tpu.memory_space<vmem>>, vector<1x32x96xbf16>
    %35 = vector.shape_cast %34 : vector<1x32x96xbf16> to vector<32x96xbf16>
    %cst_18 = arith.constant dense<0.000000e+00> : vector<8x96xf32>
    %36 = tpu.matmul %33, %35, %cst_18 {dimension_numbers = #tpu.dot_dimension_numbers<[1], [0], [0], [1], [0, 0, 1, 1], [], []>} : vector<8x32xbf16>, vector<32x96xbf16>, vector<8x96xf32> -> vector<8x96xf32>
    %c0_19 = arith.constant 0 : index
    %c0_20 = arith.constant 0 : index
    %c0_21 = arith.constant 0 : index
    %37 = vector.load %arg8[%c0_19, %c0_20, %c0_21] : memref<2x1x96xf32, #tpu.memory_space<vmem>>, vector<1x1x96xf32>
    %38 = vector.shape_cast %37 : vector<1x1x96xf32> to vector<1x96xf32>
    %39 = vector.broadcast %38 : vector<1x96xf32> to vector<8x96xf32>
    %40 = arith.addf %36, %39 : vector<8x96xf32>
    %41 = vector.extract_strided_slice %40 {offsets = [0, 0], sizes = [8, 16], strides = [1, 1]} : vector<8x96xf32> to vector<8x16xf32>
    %42 = vector.extract_strided_slice %40 {offsets = [0, 32], sizes = [8, 16], strides = [1, 1]} : vector<8x96xf32> to vector<8x16xf32>
    %43 = vector.extract_strided_slice %40 {offsets = [0, 64], sizes = [8, 16], strides = [1, 1]} : vector<8x96xf32> to vector<8x16xf32>
    %44 = arith.truncf %41 : vector<8x16xf32> to vector<8x16xbf16>
    %45 = arith.truncf %42 : vector<8x16xf32> to vector<8x16xbf16>
    %cst_22 = arith.constant dense<0.000000e+00> : vector<8x8xf32>
    %46 = tpu.matmul %44, %45, %cst_22 {dimension_numbers = #tpu.dot_dimension_numbers<[1], [1], [0], [0], [0, 0, 1, 0], [], []>} : vector<8x16xbf16>, vector<8x16xbf16>, vector<8x8xf32> -> vector<8x8xf32>
    %47 = vector.broadcast %32 : vector<1x8xf32> to vector<8x8xf32>
    %48 = arith.addf %46, %47 : vector<8x8xf32>
    %cst_23 = arith.constant dense<0xFF800000> : vector<8xf32>
    %49 = vector.multi_reduction <maximumf>, %48, %cst_23 [1] : vector<8x8xf32> to vector<8xf32>
    %50 = vector.shape_cast %49 : vector<8xf32> to vector<8x1xf32>
    %51 = vector.broadcast %50 : vector<8x1xf32> to vector<8x8xf32>
    %52 = arith.subf %48, %51 : vector<8x8xf32>
    %53 = math.exp %52 : vector<8x8xf32>
    %cst_24 = arith.constant dense<0.000000e+00> : vector<8xf32>
    %54 = vector.multi_reduction <add>, %53, %cst_24 [1] : vector<8x8xf32> to vector<8xf32>
    %55 = vector.shape_cast %54 : vector<8xf32> to vector<8x1xf32>
    %56 = tpu.reciprocal %55 {approx = true} : vector<8x1xf32> -> vector<8x1xf32>
    %57 = vector.broadcast %56 : vector<8x1xf32> to vector<8x8xf32>
    %58 = arith.mulf %53, %57 : vector<8x8xf32>
    %59 = arith.truncf %58 : vector<8x8xf32> to vector<8x8xbf16>
    %60 = arith.truncf %43 : vector<8x16xf32> to vector<8x16xbf16>
    %cst_25 = arith.constant dense<0.000000e+00> : vector<8x16xf32>
    %61 = tpu.matmul %59, %60, %cst_25 {dimension_numbers = #tpu.dot_dimension_numbers<[1], [0], [0], [1], [0, 0, 1, 1], [], []>} : vector<8x8xbf16>, vector<8x16xbf16>, vector<8x16xf32> -> vector<8x16xf32>
    %62 = vector.extract_strided_slice %40 {offsets = [0, 16], sizes = [8, 16], strides = [1, 1]} : vector<8x96xf32> to vector<8x16xf32>
    %63 = vector.extract_strided_slice %40 {offsets = [0, 48], sizes = [8, 16], strides = [1, 1]} : vector<8x96xf32> to vector<8x16xf32>
    %64 = vector.extract_strided_slice %40 {offsets = [0, 80], sizes = [8, 16], strides = [1, 1]} : vector<8x96xf32> to vector<8x16xf32>
    %65 = arith.truncf %62 : vector<8x16xf32> to vector<8x16xbf16>
    %66 = arith.truncf %63 : vector<8x16xf32> to vector<8x16xbf16>
    %cst_26 = arith.constant dense<0.000000e+00> : vector<8x8xf32>
    %67 = tpu.matmul %65, %66, %cst_26 {dimension_numbers = #tpu.dot_dimension_numbers<[1], [1], [0], [0], [0, 0, 1, 0], [], []>} : vector<8x16xbf16>, vector<8x16xbf16>, vector<8x8xf32> -> vector<8x8xf32>
    %68 = vector.broadcast %32 : vector<1x8xf32> to vector<8x8xf32>
    %69 = arith.addf %67, %68 : vector<8x8xf32>
    %cst_27 = arith.constant dense<0xFF800000> : vector<8xf32>
    %70 = vector.multi_reduction <maximumf>, %69, %cst_27 [1] : vector<8x8xf32> to vector<8xf32>
    %71 = vector.shape_cast %70 : vector<8xf32> to vector<8x1xf32>
    %72 = vector.broadcast %71 : vector<8x1xf32> to vector<8x8xf32>
    %73 = arith.subf %69, %72 : vector<8x8xf32>
    %74 = math.exp %73 : vector<8x8xf32>
    %cst_28 = arith.constant dense<0.000000e+00> : vector<8xf32>
    %75 = vector.multi_reduction <add>, %74, %cst_28 [1] : vector<8x8xf32> to vector<8xf32>
    %76 = vector.shape_cast %75 : vector<8xf32> to vector<8x1xf32>
    %77 = tpu.reciprocal %76 {approx = true} : vector<8x1xf32> -> vector<8x1xf32>
    %78 = vector.broadcast %77 : vector<8x1xf32> to vector<8x8xf32>
    %79 = arith.mulf %74, %78 : vector<8x8xf32>
    %80 = arith.truncf %79 : vector<8x8xf32> to vector<8x8xbf16>
    %81 = arith.truncf %64 : vector<8x16xf32> to vector<8x16xbf16>
    %cst_29 = arith.constant dense<0.000000e+00> : vector<8x16xf32>
    %82 = tpu.matmul %80, %81, %cst_29 {dimension_numbers = #tpu.dot_dimension_numbers<[1], [0], [0], [1], [0, 0, 1, 1], [], []>} : vector<8x8xbf16>, vector<8x16xbf16>, vector<8x16xf32> -> vector<8x16xf32>
    %83 = tpu.concatenate %61, %82 in 1 : vector<8x16xf32>, vector<8x16xf32> -> vector<8x32xf32>
    %84 = arith.truncf %83 : vector<8x32xf32> to vector<8x32xbf16>
    %c0_30 = arith.constant 0 : index
    %c0_31 = arith.constant 0 : index
    %c0_32 = arith.constant 0 : index
    %85 = vector.load %arg9[%c0_30, %c0_31, %c0_32] : memref<2x32x32xbf16, #tpu.memory_space<vmem>>, vector<1x32x32xbf16>
    %86 = vector.shape_cast %85 : vector<1x32x32xbf16> to vector<32x32xbf16>
    %cst_33 = arith.constant dense<0.000000e+00> : vector<8x32xf32>
    %87 = tpu.matmul %84, %86, %cst_33 {dimension_numbers = #tpu.dot_dimension_numbers<[1], [0], [0], [1], [0, 0, 1, 1], [], []>} : vector<8x32xbf16>, vector<32x32xbf16>, vector<8x32xf32> -> vector<8x32xf32>
    %c0_34 = arith.constant 0 : index
    %c0_35 = arith.constant 0 : index
    %c0_36 = arith.constant 0 : index
    %88 = vector.load %arg10[%c0_34, %c0_35, %c0_36] : memref<2x1x32xf32, #tpu.memory_space<vmem>>, vector<1x1x32xf32>
    %89 = vector.shape_cast %88 : vector<1x1x32xf32> to vector<1x32xf32>
    %90 = vector.broadcast %89 : vector<1x32xf32> to vector<8x32xf32>
    %91 = arith.addf %87, %90 : vector<8x32xf32>
    %92 = arith.addf %91, %25 : vector<8x32xf32>
    %c0_37 = arith.constant 0 : index
    %c0_38 = arith.constant 0 : index
    %c0_39 = arith.constant 0 : index
    %93 = vector.load %arg11[%c0_37, %c0_38, %c0_39] : memref<2x1x32xf32, #tpu.memory_space<vmem>>, vector<1x1x32xf32>
    %94 = vector.shape_cast %93 : vector<1x1x32xf32> to vector<1x32xf32>
    %c0_40 = arith.constant 0 : index
    %c0_41 = arith.constant 0 : index
    %c0_42 = arith.constant 0 : index
    %95 = vector.load %arg12[%c0_40, %c0_41, %c0_42] : memref<2x1x32xf32, #tpu.memory_space<vmem>>, vector<1x1x32xf32>
    %96 = vector.shape_cast %95 : vector<1x1x32xf32> to vector<1x32xf32>
    %cst_43 = arith.constant dense<0.000000e+00> : vector<8xf32>
    %97 = vector.multi_reduction <add>, %92, %cst_43 [1] : vector<8x32xf32> to vector<8xf32>
    %98 = vector.shape_cast %97 : vector<8xf32> to vector<8x1xf32>
    %cst_44 = arith.constant 3.200000e+01 : f32
    %99 = vector.broadcast %cst_44 : f32 to vector<8x1xf32>
    %100 = arith.divf %98, %99 : vector<8x1xf32>
    %101 = vector.broadcast %100 : vector<8x1xf32> to vector<8x32xf32>
    %102 = arith.subf %92, %101 : vector<8x32xf32>
    %103 = arith.mulf %102, %102 : vector<8x32xf32>
    %cst_45 = arith.constant dense<0.000000e+00> : vector<8xf32>
    %104 = vector.multi_reduction <add>, %103, %cst_45 [1] : vector<8x32xf32> to vector<8xf32>
    %105 = vector.shape_cast %104 : vector<8xf32> to vector<8x1xf32>
    %cst_46 = arith.constant 3.200000e+01 : f32
    %106 = vector.broadcast %cst_46 : f32 to vector<8x1xf32>
    %107 = arith.divf %105, %106 : vector<8x1xf32>
    %cst_47 = arith.constant 9.99999996E-13 : f32
    %108 = vector.broadcast %cst_47 : f32 to vector<8x1xf32>
    %109 = arith.addf %107, %108 : vector<8x1xf32>
    %110 = math.rsqrt %109 : vector<8x1xf32>
    %111 = vector.broadcast %100 : vector<8x1xf32> to vector<8x32xf32>
    %112 = arith.subf %92, %111 : vector<8x32xf32>
    %113 = vector.broadcast %110 : vector<8x1xf32> to vector<8x32xf32>
    %114 = arith.mulf %112, %113 : vector<8x32xf32>
    %115 = vector.broadcast %94 : vector<1x32xf32> to vector<8x32xf32>
    %116 = arith.mulf %114, %115 : vector<8x32xf32>
    %117 = vector.broadcast %96 : vector<1x32xf32> to vector<8x32xf32>
    %118 = arith.addf %116, %117 : vector<8x32xf32>
    %119 = arith.truncf %118 : vector<8x32xf32> to vector<8x32xbf16>
    %c0_48 = arith.constant 0 : index
    %c0_49 = arith.constant 0 : index
    %c0_50 = arith.constant 0 : index
    %120 = vector.load %arg13[%c0_48, %c0_49, %c0_50] : memref<2x32x64xbf16, #tpu.memory_space<vmem>>, vector<1x32x64xbf16>
    %121 = vector.shape_cast %120 : vector<1x32x64xbf16> to vector<32x64xbf16>
    %cst_51 = arith.constant dense<0.000000e+00> : vector<8x64xf32>
    %122 = tpu.matmul %119, %121, %cst_51 {dimension_numbers = #tpu.dot_dimension_numbers<[1], [0], [0], [1], [0, 0, 1, 1], [], []>} : vector<8x32xbf16>, vector<32x64xbf16>, vector<8x64xf32> -> vector<8x64xf32>
    %c0_52 = arith.constant 0 : index
    %c0_53 = arith.constant 0 : index
    %c0_54 = arith.constant 0 : index
    %123 = vector.load %arg14[%c0_52, %c0_53, %c0_54] : memref<2x1x64xf32, #tpu.memory_space<vmem>>, vector<1x1x64xf32>
    %124 = vector.shape_cast %123 : vector<1x1x64xf32> to vector<1x64xf32>
    %125 = vector.broadcast %124 : vector<1x64xf32> to vector<8x64xf32>
    %126 = arith.addf %122, %125 : vector<8x64xf32>
    %cst_55 = arith.constant 5.000000e-01 : f32
    %127 = vector.broadcast %cst_55 : f32 to vector<8x64xf32>
    %128 = arith.mulf %127, %126 : vector<8x64xf32>
    %cst_56 = arith.constant 4.471500e-02 : f32
    %129 = vector.broadcast %cst_56 : f32 to vector<8x64xf32>
    %130 = arith.mulf %129, %126 : vector<8x64xf32>
    %131 = arith.mulf %130, %126 : vector<8x64xf32>
    %132 = arith.mulf %131, %126 : vector<8x64xf32>
    %133 = arith.addf %126, %132 : vector<8x64xf32>
    %cst_57 = arith.constant 0.797884583 : f32
    %134 = vector.broadcast %cst_57 : f32 to vector<8x64xf32>
    %135 = arith.mulf %134, %133 : vector<8x64xf32>
    %136 = math.tanh %135 : vector<8x64xf32>
    %cst_58 = arith.constant 1.000000e+00 : f32
    %137 = vector.broadcast %cst_58 : f32 to vector<8x64xf32>
    %138 = arith.addf %137, %136 : vector<8x64xf32>
    %139 = arith.mulf %128, %138 : vector<8x64xf32>
    %140 = arith.truncf %139 : vector<8x64xf32> to vector<8x64xbf16>
    %c0_59 = arith.constant 0 : index
    %c0_60 = arith.constant 0 : index
    %c0_61 = arith.constant 0 : index
    %141 = vector.load %arg15[%c0_59, %c0_60, %c0_61] : memref<2x64x32xbf16, #tpu.memory_space<vmem>>, vector<1x64x32xbf16>
    %142 = vector.shape_cast %141 : vector<1x64x32xbf16> to vector<64x32xbf16>
    %cst_62 = arith.constant dense<0.000000e+00> : vector<8x32xf32>
    %143 = tpu.matmul %140, %142, %cst_62 {dimension_numbers = #tpu.dot_dimension_numbers<[1], [0], [0], [1], [0, 0, 1, 1], [], []>} : vector<8x64xbf16>, vector<64x32xbf16>, vector<8x32xf32> -> vector<8x32xf32>
    %c0_63 = arith.constant 0 : index
    %c0_64 = arith.constant 0 : index
    %c0_65 = arith.constant 0 : index
    %144 = vector.load %arg16[%c0_63, %c0_64, %c0_65] : memref<2x1x32xf32, #tpu.memory_space<vmem>>, vector<1x1x32xf32>
    %145 = vector.shape_cast %144 : vector<1x1x32xf32> to vector<1x32xf32>
    %146 = vector.broadcast %145 : vector<1x32xf32> to vector<8x32xf32>
    %147 = arith.addf %143, %146 : vector<8x32xf32>
    %148 = arith.addf %147, %118 : vector<8x32xf32>
    %c0_66 = arith.constant 0 : index
    %c0_67 = arith.constant 0 : index
    %c0_68 = arith.constant 0 : index
    %149 = vector.load %arg17[%c0_66, %c0_67, %c0_68] : memref<2x1x32xf32, #tpu.memory_space<vmem>>, vector<1x1x32xf32>
    %150 = vector.shape_cast %149 : vector<1x1x32xf32> to vector<1x32xf32>
    %c0_69 = arith.constant 0 : index
    %c0_70 = arith.constant 0 : index
    %c0_71 = arith.constant 0 : index
    %151 = vector.load %arg18[%c0_69, %c0_70, %c0_71] : memref<2x1x32xf32, #tpu.memory_space<vmem>>, vector<1x1x32xf32>
    %152 = vector.shape_cast %151 : vector<1x1x32xf32> to vector<1x32xf32>
    %cst_72 = arith.constant dense<0.000000e+00> : vector<8xf32>
    %153 = vector.multi_reduction <add>, %148, %cst_72 [1] : vector<8x32xf32> to vector<8xf32>
    %154 = vector.shape_cast %153 : vector<8xf32> to vector<8x1xf32>
    %cst_73 = arith.constant 3.200000e+01 : f32
    %155 = vector.broadcast %cst_73 : f32 to vector<8x1xf32>
    %156 = arith.divf %154, %155 : vector<8x1xf32>
    %157 = vector.broadcast %156 : vector<8x1xf32> to vector<8x32xf32>
    %158 = arith.subf %148, %157 : vector<8x32xf32>
    %159 = arith.mulf %158, %158 : vector<8x32xf32>
    %cst_74 = arith.constant dense<0.000000e+00> : vector<8xf32>
    %160 = vector.multi_reduction <add>, %159, %cst_74 [1] : vector<8x32xf32> to vector<8xf32>
    %161 = vector.shape_cast %160 : vector<8xf32> to vector<8x1xf32>
    %cst_75 = arith.constant 3.200000e+01 : f32
    %162 = vector.broadcast %cst_75 : f32 to vector<8x1xf32>
    %163 = arith.divf %161, %162 : vector<8x1xf32>
    %cst_76 = arith.constant 9.99999996E-13 : f32
    %164 = vector.broadcast %cst_76 : f32 to vector<8x1xf32>
    %165 = arith.addf %163, %164 : vector<8x1xf32>
    %166 = math.rsqrt %165 : vector<8x1xf32>
    %167 = vector.broadcast %156 : vector<8x1xf32> to vector<8x32xf32>
    %168 = arith.subf %148, %167 : vector<8x32xf32>
    %169 = vector.broadcast %166 : vector<8x1xf32> to vector<8x32xf32>
    %170 = arith.mulf %168, %169 : vector<8x32xf32>
    %171 = vector.broadcast %150 : vector<1x32xf32> to vector<8x32xf32>
    %172 = arith.mulf %170, %171 : vector<8x32xf32>
    %173 = vector.broadcast %152 : vector<1x32xf32> to vector<8x32xf32>
    %174 = arith.addf %172, %173 : vector<8x32xf32>
    %175 = arith.truncf %174 : vector<8x32xf32> to vector<8x32xbf16>
    %c1 = arith.constant 1 : index
    %c0_77 = arith.constant 0 : index
    %c0_78 = arith.constant 0 : index
    %176 = vector.load %arg7[%c1, %c0_77, %c0_78] : memref<2x32x96xbf16, #tpu.memory_space<vmem>>, vector<1x32x96xbf16>
    %177 = vector.shape_cast %176 : vector<1x32x96xbf16> to vector<32x96xbf16>
    %cst_79 = arith.constant dense<0.000000e+00> : vector<8x96xf32>
    %178 = tpu.matmul %175, %177, %cst_79 {dimension_numbers = #tpu.dot_dimension_numbers<[1], [0], [0], [1], [0, 0, 1, 1], [], []>} : vector<8x32xbf16>, vector<32x96xbf16>, vector<8x96xf32> -> vector<8x96xf32>
    %c1_80 = arith.constant 1 : index
    %c0_81 = arith.constant 0 : index
    %c0_82 = arith.constant 0 : index
    %179 = vector.load %arg8[%c1_80, %c0_81, %c0_82] : memref<2x1x96xf32, #tpu.memory_space<vmem>>, vector<1x1x96xf32>
    %180 = vector.shape_cast %179 : vector<1x1x96xf32> to vector<1x96xf32>
    %181 = vector.broadcast %180 : vector<1x96xf32> to vector<8x96xf32>
    %182 = arith.addf %178, %181 : vector<8x96xf32>
    %183 = vector.extract_strided_slice %182 {offsets = [0, 0], sizes = [8, 16], strides = [1, 1]} : vector<8x96xf32> to vector<8x16xf32>
    %184 = vector.extract_strided_slice %182 {offsets = [0, 32], sizes = [8, 16], strides = [1, 1]} : vector<8x96xf32> to vector<8x16xf32>
    %185 = vector.extract_strided_slice %182 {offsets = [0, 64], sizes = [8, 16], strides = [1, 1]} : vector<8x96xf32> to vector<8x16xf32>
    %186 = arith.truncf %183 : vector<8x16xf32> to vector<8x16xbf16>
    %187 = arith.truncf %184 : vector<8x16xf32> to vector<8x16xbf16>
    %cst_83 = arith.constant dense<0.000000e+00> : vector<8x8xf32>
    %188 = tpu.matmul %186, %187, %cst_83 {dimension_numbers = #tpu.dot_dimension_numbers<[1], [1], [0], [0], [0, 0, 1, 0], [], []>} : vector<8x16xbf16>, vector<8x16xbf16>, vector<8x8xf32> -> vector<8x8xf32>
    %189 = vector.broadcast %32 : vector<1x8xf32> to vector<8x8xf32>
    %190 = arith.addf %188, %189 : vector<8x8xf32>
    %cst_84 = arith.constant dense<0xFF800000> : vector<8xf32>
    %191 = vector.multi_reduction <maximumf>, %190, %cst_84 [1] : vector<8x8xf32> to vector<8xf32>
    %192 = vector.shape_cast %191 : vector<8xf32> to vector<8x1xf32>
    %193 = vector.broadcast %192 : vector<8x1xf32> to vector<8x8xf32>
    %194 = arith.subf %190, %193 : vector<8x8xf32>
    %195 = math.exp %194 : vector<8x8xf32>
    %cst_85 = arith.constant dense<0.000000e+00> : vector<8xf32>
    %196 = vector.multi_reduction <add>, %195, %cst_85 [1] : vector<8x8xf32> to vector<8xf32>
    %197 = vector.shape_cast %196 : vector<8xf32> to vector<8x1xf32>
    %198 = tpu.reciprocal %197 {approx = true} : vector<8x1xf32> -> vector<8x1xf32>
    %199 = vector.broadcast %198 : vector<8x1xf32> to vector<8x8xf32>
    %200 = arith.mulf %195, %199 : vector<8x8xf32>
    %201 = arith.truncf %200 : vector<8x8xf32> to vector<8x8xbf16>
    %202 = arith.truncf %185 : vector<8x16xf32> to vector<8x16xbf16>
    %cst_86 = arith.constant dense<0.000000e+00> : vector<8x16xf32>
    %203 = tpu.matmul %201, %202, %cst_86 {dimension_numbers = #tpu.dot_dimension_numbers<[1], [0], [0], [1], [0, 0, 1, 1], [], []>} : vector<8x8xbf16>, vector<8x16xbf16>, vector<8x16xf32> -> vector<8x16xf32>
    %204 = vector.extract_strided_slice %182 {offsets = [0, 16], sizes = [8, 16], strides = [1, 1]} : vector<8x96xf32> to vector<8x16xf32>
    %205 = vector.extract_strided_slice %182 {offsets = [0, 48], sizes = [8, 16], strides = [1, 1]} : vector<8x96xf32> to vector<8x16xf32>
    %206 = vector.extract_strided_slice %182 {offsets = [0, 80], sizes = [8, 16], strides = [1, 1]} : vector<8x96xf32> to vector<8x16xf32>
    %207 = arith.truncf %204 : vector<8x16xf32> to vector<8x16xbf16>
    %208 = arith.truncf %205 : vector<8x16xf32> to vector<8x16xbf16>
    %cst_87 = arith.constant dense<0.000000e+00> : vector<8x8xf32>
    %209 = tpu.matmul %207, %208, %cst_87 {dimension_numbers = #tpu.dot_dimension_numbers<[1], [1], [0], [0], [0, 0, 1, 0], [], []>} : vector<8x16xbf16>, vector<8x16xbf16>, vector<8x8xf32> -> vector<8x8xf32>
    %210 = vector.broadcast %32 : vector<1x8xf32> to vector<8x8xf32>
    %211 = arith.addf %209, %210 : vector<8x8xf32>
    %cst_88 = arith.constant dense<0xFF800000> : vector<8xf32>
    %212 = vector.multi_reduction <maximumf>, %211, %cst_88 [1] : vector<8x8xf32> to vector<8xf32>
    %213 = vector.shape_cast %212 : vector<8xf32> to vector<8x1xf32>
    %214 = vector.broadcast %213 : vector<8x1xf32> to vector<8x8xf32>
    %215 = arith.subf %211, %214 : vector<8x8xf32>
    %216 = math.exp %215 : vector<8x8xf32>
    %cst_89 = arith.constant dense<0.000000e+00> : vector<8xf32>
    %217 = vector.multi_reduction <add>, %216, %cst_89 [1] : vector<8x8xf32> to vector<8xf32>
    %218 = vector.shape_cast %217 : vector<8xf32> to vector<8x1xf32>
    %219 = tpu.reciprocal %218 {approx = true} : vector<8x1xf32> -> vector<8x1xf32>
    %220 = vector.broadcast %219 : vector<8x1xf32> to vector<8x8xf32>
    %221 = arith.mulf %216, %220 : vector<8x8xf32>
    %222 = arith.truncf %221 : vector<8x8xf32> to vector<8x8xbf16>
    %223 = arith.truncf %206 : vector<8x16xf32> to vector<8x16xbf16>
    %cst_90 = arith.constant dense<0.000000e+00> : vector<8x16xf32>
    %224 = tpu.matmul %222, %223, %cst_90 {dimension_numbers = #tpu.dot_dimension_numbers<[1], [0], [0], [1], [0, 0, 1, 1], [], []>} : vector<8x8xbf16>, vector<8x16xbf16>, vector<8x16xf32> -> vector<8x16xf32>
    %225 = tpu.concatenate %203, %224 in 1 : vector<8x16xf32>, vector<8x16xf32> -> vector<8x32xf32>
    %226 = arith.truncf %225 : vector<8x32xf32> to vector<8x32xbf16>
    %c1_91 = arith.constant 1 : index
    %c0_92 = arith.constant 0 : index
    %c0_93 = arith.constant 0 : index
    %227 = vector.load %arg9[%c1_91, %c0_92, %c0_93] : memref<2x32x32xbf16, #tpu.memory_space<vmem>>, vector<1x32x32xbf16>
    %228 = vector.shape_cast %227 : vector<1x32x32xbf16> to vector<32x32xbf16>
    %cst_94 = arith.constant dense<0.000000e+00> : vector<8x32xf32>
    %229 = tpu.matmul %226, %228, %cst_94 {dimension_numbers = #tpu.dot_dimension_numbers<[1], [0], [0], [1], [0, 0, 1, 1], [], []>} : vector<8x32xbf16>, vector<32x32xbf16>, vector<8x32xf32> -> vector<8x32xf32>
    %c1_95 = arith.constant 1 : index
    %c0_96 = arith.constant 0 : index
    %c0_97 = arith.constant 0 : index
    %230 = vector.load %arg10[%c1_95, %c0_96, %c0_97] : memref<2x1x32xf32, #tpu.memory_space<vmem>>, vector<1x1x32xf32>
    %231 = vector.shape_cast %230 : vector<1x1x32xf32> to vector<1x32xf32>
    %232 = vector.broadcast %231 : vector<1x32xf32> to vector<8x32xf32>
    %233 = arith.addf %229, %232 : vector<8x32xf32>
    %234 = arith.addf %233, %174 : vector<8x32xf32>
    %c1_98 = arith.constant 1 : index
    %c0_99 = arith.constant 0 : index
    %c0_100 = arith.constant 0 : index
    %235 = vector.load %arg11[%c1_98, %c0_99, %c0_100] : memref<2x1x32xf32, #tpu.memory_space<vmem>>, vector<1x1x32xf32>
    %236 = vector.shape_cast %235 : vector<1x1x32xf32> to vector<1x32xf32>
    %c1_101 = arith.constant 1 : index
    %c0_102 = arith.constant 0 : index
    %c0_103 = arith.constant 0 : index
    %237 = vector.load %arg12[%c1_101, %c0_102, %c0_103] : memref<2x1x32xf32, #tpu.memory_space<vmem>>, vector<1x1x32xf32>
    %238 = vector.shape_cast %237 : vector<1x1x32xf32> to vector<1x32xf32>
    %cst_104 = arith.constant dense<0.000000e+00> : vector<8xf32>
    %239 = vector.multi_reduction <add>, %234, %cst_104 [1] : vector<8x32xf32> to vector<8xf32>
    %240 = vector.shape_cast %239 : vector<8xf32> to vector<8x1xf32>
    %cst_105 = arith.constant 3.200000e+01 : f32
    %241 = vector.broadcast %cst_105 : f32 to vector<8x1xf32>
    %242 = arith.divf %240, %241 : vector<8x1xf32>
    %243 = vector.broadcast %242 : vector<8x1xf32> to vector<8x32xf32>
    %244 = arith.subf %234, %243 : vector<8x32xf32>
    %245 = arith.mulf %244, %244 : vector<8x32xf32>
    %cst_106 = arith.constant dense<0.000000e+00> : vector<8xf32>
    %246 = vector.multi_reduction <add>, %245, %cst_106 [1] : vector<8x32xf32> to vector<8xf32>
    %247 = vector.shape_cast %246 : vector<8xf32> to vector<8x1xf32>
    %cst_107 = arith.constant 3.200000e+01 : f32
    %248 = vector.broadcast %cst_107 : f32 to vector<8x1xf32>
    %249 = arith.divf %247, %248 : vector<8x1xf32>
    %cst_108 = arith.constant 9.99999996E-13 : f32
    %250 = vector.broadcast %cst_108 : f32 to vector<8x1xf32>
    %251 = arith.addf %249, %250 : vector<8x1xf32>
    %252 = math.rsqrt %251 : vector<8x1xf32>
    %253 = vector.broadcast %242 : vector<8x1xf32> to vector<8x32xf32>
    %254 = arith.subf %234, %253 : vector<8x32xf32>
    %255 = vector.broadcast %252 : vector<8x1xf32> to vector<8x32xf32>
    %256 = arith.mulf %254, %255 : vector<8x32xf32>
    %257 = vector.broadcast %236 : vector<1x32xf32> to vector<8x32xf32>
    %258 = arith.mulf %256, %257 : vector<8x32xf32>
    %259 = vector.broadcast %238 : vector<1x32xf32> to vector<8x32xf32>
    %260 = arith.addf %258, %259 : vector<8x32xf32>
    %261 = arith.truncf %260 : vector<8x32xf32> to vector<8x32xbf16>
    %c1_109 = arith.constant 1 : index
    %c0_110 = arith.constant 0 : index
    %c0_111 = arith.constant 0 : index
    %262 = vector.load %arg13[%c1_109, %c0_110, %c0_111] : memref<2x32x64xbf16, #tpu.memory_space<vmem>>, vector<1x32x64xbf16>
    %263 = vector.shape_cast %262 : vector<1x32x64xbf16> to vector<32x64xbf16>
    %cst_112 = arith.constant dense<0.000000e+00> : vector<8x64xf32>
    %264 = tpu.matmul %261, %263, %cst_112 {dimension_numbers = #tpu.dot_dimension_numbers<[1], [0], [0], [1], [0, 0, 1, 1], [], []>} : vector<8x32xbf16>, vector<32x64xbf16>, vector<8x64xf32> -> vector<8x64xf32>
    %c1_113 = arith.constant 1 : index
    %c0_114 = arith.constant 0 : index
    %c0_115 = arith.constant 0 : index
    %265 = vector.load %arg14[%c1_113, %c0_114, %c0_115] : memref<2x1x64xf32, #tpu.memory_space<vmem>>, vector<1x1x64xf32>
    %266 = vector.shape_cast %265 : vector<1x1x64xf32> to vector<1x64xf32>
    %267 = vector.broadcast %266 : vector<1x64xf32> to vector<8x64xf32>
    %268 = arith.addf %264, %267 : vector<8x64xf32>
    %cst_116 = arith.constant 5.000000e-01 : f32
    %269 = vector.broadcast %cst_116 : f32 to vector<8x64xf32>
    %270 = arith.mulf %269, %268 : vector<8x64xf32>
    %cst_117 = arith.constant 4.471500e-02 : f32
    %271 = vector.broadcast %cst_117 : f32 to vector<8x64xf32>
    %272 = arith.mulf %271, %268 : vector<8x64xf32>
    %273 = arith.mulf %272, %268 : vector<8x64xf32>
    %274 = arith.mulf %273, %268 : vector<8x64xf32>
    %275 = arith.addf %268, %274 : vector<8x64xf32>
    %cst_118 = arith.constant 0.797884583 : f32
    %276 = vector.broadcast %cst_118 : f32 to vector<8x64xf32>
    %277 = arith.mulf %276, %275 : vector<8x64xf32>
    %278 = math.tanh %277 : vector<8x64xf32>
    %cst_119 = arith.constant 1.000000e+00 : f32
    %279 = vector.broadcast %cst_119 : f32 to vector<8x64xf32>
    %280 = arith.addf %279, %278 : vector<8x64xf32>
    %281 = arith.mulf %270, %280 : vector<8x64xf32>
    %282 = arith.truncf %281 : vector<8x64xf32> to vector<8x64xbf16>
    %c1_120 = arith.constant 1 : index
    %c0_121 = arith.constant 0 : index
    %c0_122 = arith.constant 0 : index
    %283 = vector.load %arg15[%c1_120, %c0_121, %c0_122] : memref<2x64x32xbf16, #tpu.memory_space<vmem>>, vector<1x64x32xbf16>
    %284 = vector.shape_cast %283 : vector<1x64x32xbf16> to vector<64x32xbf16>
    %cst_123 = arith.constant dense<0.000000e+00> : vector<8x32xf32>
    %285 = tpu.matmul %282, %284, %cst_123 {dimension_numbers = #tpu.dot_dimension_numbers<[1], [0], [0], [1], [0, 0, 1, 1], [], []>} : vector<8x64xbf16>, vector<64x32xbf16>, vector<8x32xf32> -> vector<8x32xf32>
    %c1_124 = arith.constant 1 : index
    %c0_125 = arith.constant 0 : index
    %c0_126 = arith.constant 0 : index
    %286 = vector.load %arg16[%c1_124, %c0_125, %c0_126] : memref<2x1x32xf32, #tpu.memory_space<vmem>>, vector<1x1x32xf32>
    %287 = vector.shape_cast %286 : vector<1x1x32xf32> to vector<1x32xf32>
    %288 = vector.broadcast %287 : vector<1x32xf32> to vector<8x32xf32>
    %289 = arith.addf %285, %288 : vector<8x32xf32>
    %290 = arith.addf %289, %260 : vector<8x32xf32>
    %c1_127 = arith.constant 1 : index
    %c0_128 = arith.constant 0 : index
    %c0_129 = arith.constant 0 : index
    %291 = vector.load %arg17[%c1_127, %c0_128, %c0_129] : memref<2x1x32xf32, #tpu.memory_space<vmem>>, vector<1x1x32xf32>
    %292 = vector.shape_cast %291 : vector<1x1x32xf32> to vector<1x32xf32>
    %c1_130 = arith.constant 1 : index
    %c0_131 = arith.constant 0 : index
    %c0_132 = arith.constant 0 : index
    %293 = vector.load %arg18[%c1_130, %c0_131, %c0_132] : memref<2x1x32xf32, #tpu.memory_space<vmem>>, vector<1x1x32xf32>
    %294 = vector.shape_cast %293 : vector<1x1x32xf32> to vector<1x32xf32>
    %cst_133 = arith.constant dense<0.000000e+00> : vector<8xf32>
    %295 = vector.multi_reduction <add>, %290, %cst_133 [1] : vector<8x32xf32> to vector<8xf32>
    %296 = vector.shape_cast %295 : vector<8xf32> to vector<8x1xf32>
    %cst_134 = arith.constant 3.200000e+01 : f32
    %297 = vector.broadcast %cst_134 : f32 to vector<8x1xf32>
    %298 = arith.divf %296, %297 : vector<8x1xf32>
    %299 = vector.broadcast %298 : vector<8x1xf32> to vector<8x32xf32>
    %300 = arith.subf %290, %299 : vector<8x32xf32>
    %301 = arith.mulf %300, %300 : vector<8x32xf32>
    %cst_135 = arith.constant dense<0.000000e+00> : vector<8xf32>
    %302 = vector.multi_reduction <add>, %301, %cst_135 [1] : vector<8x32xf32> to vector<8xf32>
    %303 = vector.shape_cast %302 : vector<8xf32> to vector<8x1xf32>
    %cst_136 = arith.constant 3.200000e+01 : f32
    %304 = vector.broadcast %cst_136 : f32 to vector<8x1xf32>
    %305 = arith.divf %303, %304 : vector<8x1xf32>
    %cst_137 = arith.constant 9.99999996E-13 : f32
    %306 = vector.broadcast %cst_137 : f32 to vector<8x1xf32>
    %307 = arith.addf %305, %306 : vector<8x1xf32>
    %308 = math.rsqrt %307 : vector<8x1xf32>
    %309 = vector.broadcast %298 : vector<8x1xf32> to vector<8x32xf32>
    %310 = arith.subf %290, %309 : vector<8x32xf32>
    %311 = vector.broadcast %308 : vector<8x1xf32> to vector<8x32xf32>
    %312 = arith.mulf %310, %311 : vector<8x32xf32>
    %313 = vector.broadcast %292 : vector<1x32xf32> to vector<8x32xf32>
    %314 = arith.mulf %312, %313 : vector<8x32xf32>
    %315 = vector.broadcast %294 : vector<1x32xf32> to vector<8x32xf32>
    %316 = arith.addf %314, %315 : vector<8x32xf32>
    %317 = arith.truncf %316 : vector<8x32xf32> to vector<8x32xbf16>
    %c0_138 = arith.constant 0 : index
    %c0_139 = arith.constant 0 : index
    %318 = vector.load %arg19[%c0_138, %c0_139] : memref<32x2xbf16, #tpu.memory_space<vmem>>, vector<32x2xbf16>
    %cst_140 = arith.constant dense<0.000000e+00> : vector<8x2xf32>
    %319 = tpu.matmul %317, %318, %cst_140 {dimension_numbers = #tpu.dot_dimension_numbers<[1], [0], [0], [1], [0, 0, 1, 1], [], []>} : vector<8x32xbf16>, vector<32x2xbf16>, vector<8x2xf32> -> vector<8x2xf32>
    %c0_141 = arith.constant 0 : index
    %c0_142 = arith.constant 0 : index
    %320 = vector.load %arg20[%c0_141, %c0_142] : memref<1x2xf32, #tpu.memory_space<vmem>>, vector<1x2xf32>
    %321 = vector.broadcast %320 : vector<1x2xf32> to vector<8x2xf32>
    %322 = arith.addf %319, %321 : vector<8x2xf32>
    %c0_143 = arith.constant 0 : index
    %c0_144 = arith.constant 0 : index
    %c0_145 = arith.constant 0 : index
    %323 = vector.load %arg21[%c0_143, %c0_144, %c0_145] : memref<1x8x2xf32, #tpu.memory_space<vmem>>, vector<1x8x2xf32>
    %324 = vector.shape_cast %323 : vector<1x8x2xf32> to vector<8x2xf32>
    %325 = vector.shape_cast %322 : vector<8x2xf32> to vector<1x8x2xf32>
    tpu.vector_store %arg21[%c0_143, %c0_144, %c0_145], %325 {strides = array<i32>} : memref<1x8x2xf32, #tpu.memory_space<vmem>>, vector<1x8x2xf32>,
    %326 = vector.extract_strided_slice %322 {offsets = [0, 0], sizes = [8, 1], strides = [1, 1]} : vector<8x2xf32> to vector<8x1xf32>
    %327 = arith.index_cast %arg0 : i32 to index
    %328 = memref.load %arg1[%327] : memref<2xi32, #tpu.memory_space<smem>>
    %cst_146 = arith.constant dense<0xFF800000> : vector<1xf32>
    %329 = vector.multi_reduction <maximumf>, %326, %cst_146 [0] : vector<8x1xf32> to vector<1xf32>
    %330 = vector.shape_cast %329 : vector<1xf32> to vector<1x1xf32>
    %331 = vector.broadcast %330 : vector<1x1xf32> to vector<8x1xf32>
    %332 = arith.subf %326, %331 : vector<8x1xf32>
    %333 = math.exp %332 : vector<8x1xf32>
    %cst_147 = arith.constant dense<0.000000e+00> : vector<1xf32>
    %334 = vector.multi_reduction <add>, %333, %cst_147 [0] : vector<8x1xf32> to vector<1xf32>
    %335 = vector.shape_cast %334 : vector<1xf32> to vector<1x1xf32>
    %336 = math.log %335 : vector<1x1xf32>
    %337 = arith.addf %336, %330 : vector<1x1xf32>
    %338 = tpu.iota {dimensions = array<i32: 0>} : vector<8x1xi32>
    %339 = vector.broadcast %328 : i32 to vector<8x1xi32>
    %340 = arith.cmpi eq, %338, %339 : vector<8x1xi32>
    %cst_148 = arith.constant 0.000000e+00 : f32
    %341 = vector.broadcast %cst_148 : f32 to vector<8x1xf32>
    %342 = arith.select %340, %326, %341 : vector<8x1xi1>, vector<8x1xf32>
    %cst_149 = arith.constant dense<0.000000e+00> : vector<1xf32>
    %343 = vector.multi_reduction <add>, %342, %cst_149 [0] : vector<8x1xf32> to vector<1xf32>
    %344 = vector.shape_cast %343 : vector<1xf32> to vector<1x1xf32>
    %345 = arith.subf %337, %344 : vector<1x1xf32>
    %346 = vector.extract_strided_slice %322 {offsets = [0, 1], sizes = [8, 1], strides = [1, 1]} : vector<8x2xf32> to vector<8x1xf32>
    %347 = arith.index_cast %arg0 : i32 to index
    %348 = memref.load %arg2[%347] : memref<2xi32, #tpu.memory_space<smem>>
    %cst_150 = arith.constant dense<0xFF800000> : vector<1xf32>
    %349 = vector.multi_reduction <maximumf>, %346, %cst_150 [0] : vector<8x1xf32> to vector<1xf32>
    %350 = vector.shape_cast %349 : vector<1xf32> to vector<1x1xf32>
    %351 = vector.broadcast %350 : vector<1x1xf32> to vector<8x1xf32>
    %352 = arith.subf %346, %351 : vector<8x1xf32>
    %353 = math.exp %352 : vector<8x1xf32>
    %cst_151 = arith.constant dense<0.000000e+00> : vector<1xf32>
    %354 = vector.multi_reduction <add>, %353, %cst_151 [0] : vector<8x1xf32> to vector<1xf32>
    %355 = vector.shape_cast %354 : vector<1xf32> to vector<1x1xf32>
    %356 = math.log %355 : vector<1x1xf32>
    %357 = arith.addf %356, %350 : vector<1x1xf32>
    %358 = tpu.iota {dimensions = array<i32: 0>} : vector<8x1xi32>
    %359 = vector.broadcast %348 : i32 to vector<8x1xi32>
    %360 = arith.cmpi eq, %358, %359 : vector<8x1xi32>
    %cst_152 = arith.constant 0.000000e+00 : f32
    %361 = vector.broadcast %cst_152 : f32 to vector<8x1xf32>
    %362 = arith.select %360, %346, %361 : vector<8x1xi1>, vector<8x1xf32>
    %cst_153 = arith.constant dense<0.000000e+00> : vector<1xf32>
    %363 = vector.multi_reduction <add>, %362, %cst_153 [0] : vector<8x1xf32> to vector<1xf32>
    %364 = vector.shape_cast %363 : vector<1xf32> to vector<1x1xf32>
    %365 = arith.subf %357, %364 : vector<1x1xf32>
    %366 = arith.addf %345, %365 : vector<1x1xf32>
    %c0_154 = arith.constant 0 : index
    %c0_155 = arith.constant 0 : index
    %c0_156 = arith.constant 0 : index
    %367 = vector.load %arg22[%c0_154, %c0_155, %c0_156] : memref<1x1x1xf32, #tpu.memory_space<vmem>>, vector<1x1x1xf32>
    %368 = vector.shape_cast %367 : vector<1x1x1xf32> to vector<1x1xf32>
    %369 = vector.shape_cast %366 : vector<1x1xf32> to vector<1x1x1xf32>
    tpu.vector_store %arg22[%c0_154, %c0_155, %c0_156], %369 {strides = array<i32>} : memref<1x1x1xf32, #tpu.memory_space<vmem>>, vector<1x1x1xf32>,
    return
  }
  func.func @transform_0(%arg0: i32, %arg1: memref<2xi32, #tpu.memory_space<smem>>, %arg2: memref<2xi32, #tpu.memory_space<smem>>) -> (i32, i32, i32) {
    %c0_i32 = arith.constant 0 : i32
    %c0_i32_0 = arith.constant 0 : i32
    %c0_i32_1 = arith.constant 0 : i32
    return %arg0, %c0_i32, %c0_i32_0 : i32, i32, i32
  }
  func.func @transform_1(%arg0: i32, %arg1: memref<2xi32, #tpu.memory_space<smem>>, %arg2: memref<2xi32, #tpu.memory_space<smem>>) -> (i32, i32, i32) {
    %c0_i32 = arith.constant 0 : i32
    %c0_i32_0 = arith.constant 0 : i32
    %c0_i32_1 = arith.constant 0 : i32
    return %arg0, %c0_i32, %c0_i32_0 : i32, i32, i32
  }
  func.func @transform_2(%arg0: i32, %arg1: memref<2xi32, #tpu.memory_space<smem>>, %arg2: memref<2xi32, #tpu.memory_space<smem>>) -> (i32, i32) {
    %c0_i32 = arith.constant 0 : i32
    %c0_i32_0 = arith.constant 0 : i32
    %c0_i32_1 = arith.constant 0 : i32
    return %c0_i32, %c0_i32_0 : i32, i32
  }
  func.func @transform_3(%arg0: i32, %arg1: memref<2xi32, #tpu.memory_space<smem>>, %arg2: memref<2xi32, #tpu.memory_space<smem>>) -> (i32, i32) {
    %c0_i32 = arith.constant 0 : i32
    %c0_i32_0 = arith.constant 0 : i32
    %c0_i32_1 = arith.constant 0 : i32
    return %c0_i32, %c0_i32_0 : i32, i32
  }
  func.func @transform_4(%arg0: i32, %arg1: memref<2xi32, #tpu.memory_space<smem>>, %arg2: memref<2xi32, #tpu.memory_space<smem>>) -> (i32, i32, i32) {
    %c0_i32 = arith.constant 0 : i32
    %c0_i32_0 = arith.constant 0 : i32
    %c0_i32_1 = arith.constant 0 : i32
    %c0_i32_2 = arith.constant 0 : i32
    return %c0_i32, %c0_i32_0, %c0_i32_1 : i32, i32, i32
  }
  func.func @transform_5(%arg0: i32, %arg1: memref<2xi32, #tpu.memory_space<smem>>, %arg2: memref<2xi32, #tpu.memory_space<smem>>) -> (i32, i32, i32) {
    %c0_i32 = arith.constant 0 : i32
    %c0_i32_0 = arith.constant 0 : i32
    %c0_i32_1 = arith.constant 0 : i32
    %c0_i32_2 = arith.constant 0 : i32
    return %c0_i32, %c0_i32_0, %c0_i32_1 : i32, i32, i32
  }
  func.func @transform_6(%arg0: i32, %arg1: memref<2xi32, #tpu.memory_space<smem>>, %arg2: memref<2xi32, #tpu.memory_space<smem>>) -> (i32, i32, i32) {
    %c0_i32 = arith.constant 0 : i32
    %c0_i32_0 = arith.constant 0 : i32
    %c0_i32_1 = arith.constant 0 : i32
    %c0_i32_2 = arith.constant 0 : i32
    return %c0_i32, %c0_i32_0, %c0_i32_1 : i32, i32, i32
  }
  func.func @transform_7(%arg0: i32, %arg1: memref<2xi32, #tpu.memory_space<smem>>, %arg2: memref<2xi32, #tpu.memory_space<smem>>) -> (i32, i32, i32) {
    %c0_i32 = arith.constant 0 : i32
    %c0_i32_0 = arith.constant 0 : i32
    %c0_i32_1 = arith.constant 0 : i32
    %c0_i32_2 = arith.constant 0 : i32
    return %c0_i32, %c0_i32_0, %c0_i32_1 : i32, i32, i32
  }
  func.func @transform_8(%arg0: i32, %arg1: memref<2xi32, #tpu.memory_space<smem>>, %arg2: memref<2xi32, #tpu.memory_space<smem>>) -> (i32, i32, i32) {
    %c0_i32 = arith.constant 0 : i32
    %c0_i32_0 = arith.constant 0 : i32
    %c0_i32_1 = arith.constant 0 : i32
    %c0_i32_2 = arith.constant 0 : i32
    return %c0_i32, %c0_i32_0, %c0_i32_1 : i32, i32, i32
  }
  func.func @transform_9(%arg0: i32, %arg1: memref<2xi32, #tpu.memory_space<smem>>, %arg2: memref<2xi32, #tpu.memory_space<smem>>) -> (i32, i32, i32) {
    %c0_i32 = arith.constant 0 : i32
    %c0_i32_0 = arith.constant 0 : i32
    %c0_i32_1 = arith.constant 0 : i32
    %c0_i32_2 = arith.constant 0 : i32
    return %c0_i32, %c0_i32_0, %c0_i32_1 : i32, i32, i32
  }
  func.func @transform_10(%arg0: i32, %arg1: memref<2xi32, #tpu.memory_space<smem>>, %arg2: memref<2xi32, #tpu.memory_space<smem>>) -> (i32, i32, i32) {
    %c0_i32 = arith.constant 0 : i32
    %c0_i32_0 = arith.constant 0 : i32
    %c0_i32_1 = arith.constant 0 : i32
    %c0_i32_2 = arith.constant 0 : i32
    return %c0_i32, %c0_i32_0, %c0_i32_1 : i32, i32, i32
  }
  func.func @transform_11(%arg0: i32, %arg1: memref<2xi32, #tpu.memory_space<smem>>, %arg2: memref<2xi32, #tpu.memory_space<smem>>) -> (i32, i32, i32) {
    %c0_i32 = arith.constant 0 : i32
    %c0_i32_0 = arith.constant 0 : i32
    %c0_i32_1 = arith.constant 0 : i32
    %c0_i32_2 = arith.constant 0 : i32
    return %c0_i32, %c0_i32_0, %c0_i32_1 : i32, i32, i32
  }
  func.func @transform_12(%arg0: i32, %arg1: memref<2xi32, #tpu.memory_space<smem>>, %arg2: memref<2xi32, #tpu.memory_space<smem>>) -> (i32, i32, i32) {
    %c0_i32 = arith.constant 0 : i32
    %c0_i32_0 = arith.constant 0 : i32
    %c0_i32_1 = arith.constant 0 : i32
    %c0_i32_2 = arith.constant 0 : i32
    return %c0_i32, %c0_i32_0, %c0_i32_1 : i32, i32, i32
  }
  func.func @transform_13(%arg0: i32, %arg1: memref<2xi32, #tpu.memory_space<smem>>, %arg2: memref<2xi32, #tpu.memory_space<smem>>) -> (i32, i32, i32) {
    %c0_i32 = arith.constant 0 : i32
    %c0_i32_0 = arith.constant 0 : i32
    %c0_i32_1 = arith.constant 0 : i32
    %c0_i32_2 = arith.constant 0 : i32
    return %c0_i32, %c0_i32_0, %c0_i32_1 : i32, i32, i32
  }
  func.func @transform_14(%arg0: i32, %arg1: memref<2xi32, #tpu.memory_space<smem>>, %arg2: memref<2xi32, #tpu.memory_space<smem>>) -> (i32, i32, i32) {
    %c0_i32 = arith.constant 0 : i32
    %c0_i32_0 = arith.constant 0 : i32
    %c0_i32_1 = arith.constant 0 : i32
    %c0_i32_2 = arith.constant 0 : i32
    return %c0_i32, %c0_i32_0, %c0_i32_1 : i32, i32, i32
  }
  func.func @transform_15(%arg0: i32, %arg1: memref<2xi32, #tpu.memory_space<smem>>, %arg2: memref<2xi32, #tpu.memory_space<smem>>) -> (i32, i32, i32) {
    %c0_i32 = arith.constant 0 : i32
    %c0_i32_0 = arith.constant 0 : i32
    %c0_i32_1 = arith.constant 0 : i32
    %c0_i32_2 = arith.constant 0 : i32
    return %c0_i32, %c0_i32_0, %c0_i32_1 : i32, i32, i32
  }
  func.func @transform_16(%arg0: i32, %arg1: memref<2xi32, #tpu.memory_space<smem>>, %arg2: memref<2xi32, #tpu.memory_space<smem>>) -> (i32, i32) {
    %c0_i32 = arith.constant 0 : i32
    %c0_i32_0 = arith.constant 0 : i32
    %c0_i32_1 = arith.constant 0 : i32
    return %c0_i32, %c0_i32_0 : i32, i32
  }
  func.func @transform_17(%arg0: i32, %arg1: memref<2xi32, #tpu.memory_space<smem>>, %arg2: memref<2xi32, #tpu.memory_space<smem>>) -> (i32, i32) {
    %c0_i32 = arith.constant 0 : i32
    %c0_i32_0 = arith.constant 0 : i32
    %c0_i32_1 = arith.constant 0 : i32
    return %c0_i32, %c0_i32_0 : i32, i32
  }
  func.func @transform_18(%arg0: i32, %arg1: memref<2xi32, #tpu.memory_space<smem>>, %arg2: memref<2xi32, #tpu.memory_space<smem>>) -> (i32, i32, i32) {
    %c0_i32 = arith.constant 0 : i32
    %c0_i32_0 = arith.constant 0 : i32
    %c0_i32_1 = arith.constant 0 : i32
    return %arg0, %c0_i32, %c0_i32_0 : i32, i32, i32
  }
  func.func @transform_19(%arg0: i32, %arg1: memref<2xi32, #tpu.memory_space<smem>>, %arg2: memref<2xi32, #tpu.memory_space<smem>>) -> (i32, i32, i32) {
    %c0_i32 = arith.constant 0 : i32
    %c0_i32_0 = arith.constant 0 : i32
    %c0_i32_1 = arith.constant 0 : i32
    return %arg0, %c0_i32, %c0_i32_0 : i32, i32, i32
  }
}

</mosaic_0001>

<bundles_post_ra>
// kernel: bert_ad_forward.1
= control target key start
LH: loop header
LB: loop body
LE: loop exit
PB: predicated region body
PF: predicated region fallthrough
CT: control target
= control target key end

     0   :  { %s1889_s29 = smov [#allocation3]   ;;  %s2273_s0 = inlined_call_operand.vmem [shape: s32[2], index: 0, kind: input, shape index: {}]   ;;  %s2274_s2 = inlined_call_operand.vmem [shape: f32[2,8,32], index: 2, kind: input, shape index: {}]   ;;  %s2275_s3 = inlined_call_operand.vmem [shape: s32[2,1,8], index: 3, kind: input, shape index: {}]   ;;  %s2276_s4 = inlined_call_operand.vmem [shape: f32[1,32], index: 4, kind: input, shape index: {}]   ;;  %s2277_s5 = inlined_call_operand.vmem [shape: f32[1,32], index: 5, kind: input, shape index: {}]   ;;  %s2278_s6 = inlined_call_operand.vmem [shape: bf16[2,32,96], index: 6, kind: input, shape index: {}]   ;;  %s2279_s7 = inlined_call_operand.vmem [shape: f32[2,1,96], index: 7, kind: input, shape index: {}]   ;;  %s2280_s8 = inlined_call_operand.vmem [shape: bf16[2,32,32], index: 8, kind: input, shape index: {}]   ;;  %s2281_s9 = inlined_call_operand.vmem [shape: f32[2,1,32], index: 9, kind: input, shape index: {}]   ;;  %s2282_s10 = inlined_call_operand.vmem [shape: f32[2,1,32], index: 10, kind: input, shape index: {}]   ;;  %s2283_s11 = inlined_call_operand.vmem [shape: f32[2,1,32], index: 11, kind: input, shape index: {}]   ;;  %s2284_s12 = inlined_call_operand.vmem [shape: bf16[2,32,64], index: 12, kind: input, shape index: {}]   ;;  %s2285_s13 = inlined_call_operand.vmem [shape: f32[2,1,64], index: 13, kind: input, shape index: {}]   ;;  %s2286_s14 = inlined_call_operand.vmem [shape: bf16[2,64,32], index: 14, kind: input, shape index: {}]   ;;  %s2287_s15 = inlined_call_operand.vmem [shape: f32[2,1,32], index: 15, kind: input, shape index: {}]   ;;  %s2288_s16 = inlined_call_operand.vmem [shape: f32[2,1,32], index: 16, kind: input, shape index: {}]   ;;  %s2289_s17 = inlined_call_operand.vmem [shape: f32[2,1,32], index: 17, kind: input, shape index: {}]   ;;  %s2290_s18 = inlined_call_operand.vmem [shape: bf16[32,2], index: 18, kind: input, shape index: {}]   ;;  %s2291_s19 = inlined_call_operand.vmem [shape: f32[1,2], index: 19, kind: input, shape index: {}]   ;;  %s2292_s20 = inlined_call_operand.vmem [shape: f32[2,8,2], index: 20, kind: output, shape index: {0}]   ;;  %s2293_s21 = inlined_call_operand.vmem [shape: f32[2,1,1], index: 21, kind: output, shape index: {1}]   ;;  %s2294_s1 = inlined_call_operand.vmem [shape: s32[2], index: 1, kind: input, shape index: {}]  }
   0x1   :  { %2301 = sst [smem:[#allocation6_spill]] %s2273_s0  ;;  %s33_s28 = sshll.u32 %s2294_s1, 4  ;;  %s34_s28 = int_to_ptr.vmem [resolvable:$true] %s33_s28 }
   0x2   :  { %2302 = sst [smem:[#allocation7_spill]] %s2274_s2  ;;  %s1890_s0 = smov [#allocation4]  }
   0x3   :  { %2303 = sst [smem:[#allocation8_spill]] %s2275_s3 }
   0x4   :  { %2304 = sst [smem:[#allocation9_spill]] %s2276_s4 }
   0x5   :  { %2305 = sst [smem:[#allocation10_spill]] %s2277_s5 }
   0x6   :  { %2306 = sst [smem:[#allocation11_spill]] %s2278_s6 }
   0x7   :  { %2307 = sst [smem:[#allocation12_spill]] %s2288_s16 }
   0x8   :  { %s2308_s26 = sld [smem:[#allocation6_spill]] }
   0xe   :  { %s28_s16 = sshll.u32 %s2308_s26, 4  ;;  %s29_s16 = int_to_ptr.vmem [resolvable:$true] %s28_s16 }
   0xf   :  { %31 = dma.vmem_to_smem %s29_s16, 16, %s1889_s29, [#allocation2] }
  0x10   :  { %36 = dma.vmem_to_smem %s34_s28, 16, %s1890_s0, [#allocation2] }
  0x11   :  { %1883 = dma.done.wait [#allocation2], 32 }
  0x12   :  { %1884 = vsyncadd [#allocation2], 4294967264 }
  0x13   :  { %39 = sfence }
  0x14   :  { %s2015_s5 = smov 0  }
  0x15 LB: > { %s2021_s1 = sadd.s32 4294967295, %s1887_s5   ;;  %p1618_p0 = scmp.ge.s32.totalorder %s1887_s5, 1  ;;  %s1887_s5 = sphi %s2015_s5, %s45_s5  }
  0x16   : > { %p562_p1 = scmp.lt.s32.totalorder %s1887_s5, 3 }
  0x18   : > { %p563_p2 = pnand %p1618_p0, %p562_p1 }
  0x19   : > { %p622_p3 = scmp.lt.s32.totalorder (!%p563_p2), %s2021_s1, 1  ;;  %s2309_s23 = sld [smem:[#allocation7_spill]] (!%p563_p2) }
  0x1a   : > { %566 = sbr.rel (%p563_p2) target bundleno = 4324 (0x10e4), region = 92  ;;  %s2310_s25 = sld [smem:[#allocation11_spill]] (!%p563_p2) }
  0x1b   : > { %s2311_s29 = sld [smem:[#allocation9_spill]] (!%p563_p2)  ;;  %s1892_s24 = smov (!%p563_p2), 112  }
  0x1c   : > { %s2312_s22 = sld [smem:[#allocation10_spill]] (!%p563_p2)  ;;  %s2300_s3 = smov (!%p563_p2), 96  }
  0x1d   : > { %s1894_s26 = smov (!%p563_p2), 80   ;;  %s2313_s28 = sld [smem:[#allocation8_spill]] (!%p563_p2) }
  0x1e   : > { %s1895_s0 = smov (!%p563_p2), 48   ;;  %s2299_s6 = smov (!%p563_p2), 64  }
  0x1f   : > { %s2027_s16 = scalar_select %p622_p3, %s2021_s1, 1  ;;  %vm640_vm0 = vcmask 261120   ;;  %v1891_v2 = vmov 32.0   ;;  %v1798_v32 = vld [vmem:[%s2279_s7] ss:$0 sm:$0xff]  ;;  %vm726_vm5 = vcmask 130048  }
  0x20   : > { %1815 = vrcp.f32 %v1891_v2  ;;  %v1757_v14 = vld [vmem:[%s2310_s25 + $0x8] sm:$0xff]  ;;  %v1756_v15 = vld [vmem:[%s2310_s25] sm:$0xff]  ;;  %vm746_vm6 = vcmask 64512   ;;  %vm764_vm7 = vcmask 1043456   ;;  %vm995_vm11 = vcmask 523264   ;;  %s2316_s27 = smov 64  }
  0x21   : > { %s2297_s30 = sshll.u32 %s2027_s16, 3  ;;  %712 = vmatpush.bf16.msra.mxu0 %v1757_v14  ;;  %v1796_v25 = vld [vmem:[%s2311_s29] ss:$0 sm:$0xff]  ;;  %v1759_v14 = vld [vmem:[%s2280_s8 + $0x8] sm:$0xff] }
  0x22   : > { %s625_s2 = scalar_lea.vmem %s2309_s23, %s2297_s30  ;;  %v1797_v28 = vld [vmem:[%s2312_s22] ss:$0 sm:$0xff]  ;;  %s2314_s22 = sld [smem:[#allocation12_spill]] }
  0x23   : > { %v637_v0 = vld [vmem:[%s625_s2] sm:$0xff]  ;;  %s628_s29 = scalar_lea.vmem %s2313_s28, %s2027_s16  ;;  %s2298_s2 = smov 16  }
  0x24   : > { %v641_v1 = vsel %vm640_vm0, %v637_v0, 0.0  ;;  %v678_v42 = vld [vmem:[%s628_s29] sm:$0x1]  ;;  %s1487_s23 = sld [smem:[#allocation4 + %s2021_s1]] }
  0x25   : > { %642 = vadd.xlane.f32.xlu0 %v641_v1  ;;  %713 = vmatpush.bf16.msra.mxu0 %v1756_v15  ;;  %v679_v43 = vcvt.s32.f32 %v678_v42 }
  0x26   : > { %v1816_v3 = vpop.eup %1815 }
  0x27   : > { %v645_v4 = vmul.f32 32.0, %v1816_v3  ;;  %vm649_vm1 = vweird.f32 %v1816_v3  ;;  %v680_v44 = vsub.f32 1.0, %v679_v43 }
  0x29   : > { %v646_v5 = vsub.f32 1.0, %v645_v4  ;;  %v681_v45 = vmul.f32 -1e+09, %v680_v44  ;;  %872 = vmatpush.bf16.msrb.mxu0 %v1759_v14 }
  0x2b   : > { %v647_v6 = vmul.f32 %v1816_v3, %v646_v5  ;;  %v2072_v46 = vperm.slane %v681_v45, 0  ;;  %v1800_v45 = vld [vmem:[%s2282_s10] ss:$0 sm:$0xff] }
  0x2d   : > { %v648_v7 = vadd.f32 %v1816_v3, %v647_v6 }
  0x2f   : > { %v2036_v8 = vsel %vm649_vm1, %v1816_v3, %v648_v7 }
  0x98   : > { %v643_v9 = vpop.xlane.xlu0 %642 }
  0x99   : > { %v651_v10 = vmul.f32 %v2036_v8, %v643_v9 }
  0x9b   : > { %v652_v11 = vsub.f32 %v637_v0, %v651_v10 }
  0x9d   : > { %v653_v12 = vmul.f32 %v652_v11, %v652_v11 }
  0x9f   : > { %v654_v13 = vsel %vm640_vm0, %v653_v12, 0.0 }
  0xa0   : > { %655 = vadd.xlane.f32.xlu0 %v654_v13 }
 0x113   : > { %v656_v16 = vpop.xlane.xlu0 %655 }
 0x114   : > { %v657_v17 = vmul.f32 %v656_v16, %v2036_v8 }
 0x116   : > { %v658_v18 = vadd.f32 1e-12, %v657_v17 }
 0x118   : > { %1817 = vrsqrt.f32 %v658_v18  ;;  %vm665_vm3 = vweird.f32 %v658_v18 }
 0x11e   : > { %v1818_v19 = vpop.eup %1817 }
 0x11f   : > { %v660_v20 = vmul.f32 %v1818_v19, %v658_v18  ;;  %vm666_vm2 = vweird.f32 %v1818_v19 }
 0x120   : > { %vm667_vm4 = vmor %vm665_vm3, %vm666_vm2 }
 0x121   : > { %v661_v21 = vmul.f32 %v1818_v19, %v660_v20 }
 0x123   : > { %v662_v22 = vmul.f32 0.5, %v661_v21 }
 0x125   : > { %v663_v23 = vsub.f32 1.5, %v662_v22 }
 0x127   : > { %v664_v24 = vmul.f32 %v1818_v19, %v663_v23  ;;  %v1799_v23 = vld [vmem:[%s2281_s9] ss:$0 sm:$0xff] }
 0x129   : > { %v668_v26 = vsel %vm667_vm4, %v1818_v19, %v664_v24  ;;  %v1758_v19 = vld [vmem:[%s2280_s8] sm:$0xff] }
 0x12a   : > { %v669_v27 = vmul.f32 %v668_v26, %v652_v11  ;;  %873 = vmatpush.bf16.msrb.mxu0 %v1758_v19  ;;  %v1767_v19 = vld [vmem:[%s2310_s25 + $0x18] sm:$0xff] }
 0x12c   : > { %v673_v29 = vmul.f32 %v1796_v25, %v669_v27 }
 0x12e   : > { %v2053_v30 = vadd.f32 %v1797_v28, %v673_v29 }
 0x130   : > { %v682_v31 = vpack.c.bf16 %v2053_v30, %v2053_v30 }
 0x132   : > { %1629 = vmatmul.msk.bf16.vlgmr.msra.gmra.mxu0 %vm640_vm0, %v682_v31 }
 0x1af   : > { %v715_v33 = vpop.f32.mrf.mxu0 }
 0x1b0   : > { %v716_v34 = vadd.f32 %v1798_v32, %v715_v33 }
 0x1b2   : > { %v719_v35 = vpack.c.bf16 %v716_v34, %v716_v34 }
 0x1b4   : > { %781 = vrot.lane.b32.xlu2 %v719_v35, %s1892_s24  ;;  %724 = vrot.lane.b32.xlu1 %v719_v35, %s2300_s3 }
 0x1b7   : > { %v717_v36 = vpop.f32.mrf.mxu0 }
 0x1bc   : > { %783 = vrot.lane.b32.xlu1 %v719_v35, %s1894_s26 }
 0x20e   : > { %v782_v41 = vpop.permute.xlu2 %781 }
 0x226   : > { %v725_v37 = vpop.permute.xlu1 %724 }
 0x227   : > { %v731_v38 = vsel %vm726_vm5, %v725_v37, 0 }
 0x228   : > { %740 = vmatpush.bf16.xpose.msra.mxu1 %v731_v38 }
 0x22e   : > { %v784_v39 = vpop.permute.xlu1 %783 }
 0x22f   : > { %1630 = vmatmul.msk.bf16.vlgmr.msra.gmra.mxu1 %vm726_vm5, %v719_v35  ;;  %v789_v40 = vsel %vm726_vm5, %v784_v39, 0 }
 0x230   : > { %798 = vmatpush.bf16.xpose.msra.mxu3 %v789_v40 }
 0x237   : > { %1632 = vmatmul.msk.bf16.vlgmr.msra.gmra.mxu3 %vm726_vm5, %v782_v41 }
 0x2ac   : > { %v742_v47 = vpop.f32.mrf.mxu1 }
 0x2ad   : > { %v743_v48 = vadd.f32 %v742_v47, %v2072_v46 }
 0x2af   : > { %v747_v49 = vsel %vm746_vm6, %v743_v48, -inf }
 0x2b0   : > { %748 = vmax.xlane.f32.xlu2 %v747_v49  ;;  %v1801_v49 = vld [vmem:[%s2283_s11] ss:$0 sm:$0xff] }
 0x2b4   : > { %v744_v50 = vpop.f32.mrf.mxu1 }
 0x2ba   : > { %v800_v51 = vpop.f32.mrf.mxu3 }
 0x2bb   : > { %v801_v52 = vadd.f32 %v800_v51, %v2072_v46 }
 0x2bd   : > { %v804_v53 = vsel %vm746_vm6, %v801_v52, -inf }
 0x2be   : > { %805 = vmax.xlane.f32.xlu0 %v804_v53  ;;  %v1765_v53 = vld [vmem:[%s2286_s14 + $0x18] sm:$0xff] }
 0x2bf   : > { %1003 = vmatpush.bf16.msrb.mxu3 %v1765_v53 }
 0x2c2   : > { %v802_v54 = vpop.f32.mrf.mxu3 }
 0x2c3   : > { %v1764_v54 = vld [vmem:[%s2286_s14 + $0x10] sm:$0xff] }
 0x2c4   : > { %1004 = vmatpush.bf16.msrb.mxu3 %v1764_v54 }
 0x2c8   : > { %816 = vrot.lane.b32.xlu2 %v719_v35, %s1895_s0 }
 0x2d2   : > { %759 = vrot.lane.b32.xlu0 %v719_v35, %s2299_s6  ;;  %v1761_v35 = vld [vmem:[%s2284_s12 + $0x8] sm:$0xff]  ;;  %s635_s6 = scalar_lea.vmem %s2293_s21, %s2027_s16 }
 0x2d3   : > { %942 = vmatpush.bf16.msrb.mxu1 %v1761_v35 }
 0x323   : > { %v749_v55 = vpop.xlane.xlu2 %748 }
 0x324   : > { %v750_v56 = vsub.f32 %v743_v48, %v749_v55  ;;  %v1763_v55 = vld [vmem:[%s2286_s14 + $0x8] sm:$0xff] }
 0x325   : > { %1005 = vmatpush.bf16.msrb.mxu3 %v1763_v55 }
 0x326   : > { %v751_v57 = vmul.f32 1.442695, %v750_v56  ;;  %v1762_v56 = vld [vmem:[%s2286_s14] sm:$0xff] }
 0x328   : > { %1819 = vpow2.f32 %v751_v57  ;;  %v1802_v57 = vld [vmem:[%s2285_s13] ss:$0 sm:$0xff] }
 0x329   : > { %1006 = vmatpush.bf16.msrb.mxu3 %v1762_v56 }
 0x32b   : > { %v817_v1 = vpop.permute.xlu2 %816 }
 0x32c   : > { %v822_v4 = vsel %vm764_vm7, %v817_v1, 0 }
 0x32e   : > { %v1820_v58 = vpop.eup %1819 }
 0x32f   : > { %v753_v59 = vsel %vm746_vm6, %v1820_v58, 0.0 }
 0x330   : > { %754 = vadd.xlane.f32.xlu1 %v753_v59 }
 0x331   : > { %v806_v60 = vpop.xlane.xlu0 %805 }
 0x332   : > { %v807_v61 = vsub.f32 %v801_v52, %v806_v60 }
 0x334   : > { %v808_v62 = vmul.f32 1.442695, %v807_v61 }
 0x336   : > { %1821 = vpow2.f32 %v808_v62 }
 0x33c   : > { %v1822_v63 = vpop.eup %1821 }
 0x33d   : > { %v810_v0 = vsel %vm746_vm6, %v1822_v63, 0.0 }
 0x33e   : > { %811 = vadd.xlane.f32.xlu0 %v810_v0 }
 0x344   : > { %v760_v2 = vpop.permute.xlu0 %759 }
 0x345   : > { %v766_v3 = vsel %vm764_vm7, %v760_v2, 0 }
 0x346   : > { %775 = vmatpush.bf16.msra.mxu2 %v766_v3 }
 0x34a   : > { %831 = vmatpush.bf16.msrb.mxu2 %v822_v4 }
 0x3a3   : > { %v755_v5 = vpop.xlane.xlu1 %754 }
 0x3a4   : > { %1823 = vrcp.f32 %v755_v5 }
 0x3aa   : > { %v1824_v6 = vpop.eup %1823 }
 0x3ab   : > { %v757_v7 = vmul.f32 %v1824_v6, %v1820_v58 }
 0x3ad   : > { %v758_v9 = vpack.c.bf16 %v757_v7, %v757_v7  ;;  %v1803_v7 = vld [vmem:[%s2287_s15] ss:$0 sm:$0xff] }
 0x3af   : > { %1631 = vmatmul.msk.bf16.vlgmr.msra.gmra.mxu2 %vm746_vm6, %v758_v9 }
 0x3b0   : > { %1077 = vmatpush.bf16.msra.mxu2 %v1767_v19  ;;  %v1768_v19 = vld [vmem:[%s2280_s8 + $0x10] sm:$0xff] }
 0x3b1   : > { %v812_v10 = vpop.xlane.xlu0 %811 }
 0x3b2   : > { %1825 = vrcp.f32 %v812_v10 }
 0x3b8   : > { %v1826_v11 = vpop.eup %1825 }
 0x3b9   : > { %v814_v12 = vmul.f32 %v1826_v11, %v1822_v63 }
 0x3bb   : > { %v815_v13 = vpack.c.bf16 %v814_v12, %v814_v12 }
 0x3bf   : > { %1633 = vmatmul.msk.bf16.vlgmr.msrb.gmra.mxu2 %vm746_vm6, %v815_v13 }
 0x432   : > { %v777_v15 = vpop.f32.mrf.mxu2 }
 0x43a   : > { %v779_v16 = vpop.f32.mrf.mxu2 }
 0x442   : > { %v833_v17 = vpop.f32.mrf.mxu2 }
 0x443   : > { %838 = vrot.lane.b32.xlu1 %v833_v17, %s2298_s2  ;;  %s2315_s2 = smov 96  }
 0x44a   : > { %v835_v18 = vpop.f32.mrf.mxu2 }
 0x4b5   : > { %v839_v20 = vpop.permute.xlu1 %838 }
 0x4b6   : > { %v841_v21 = vsel %vm726_vm5, %v777_v15, %v839_v20  ;;  %v1766_v20 = vld [vmem:[%s2310_s25 + $0x10] sm:$0xff] }
 0x4b7   : > { %v842_v22 = vpack.c.bf16 %v841_v21, %v841_v21  ;;  %1078 = vmatpush.bf16.msra.mxu2 %v1766_v20 }
 0x4b9   : > { %1642 = vmatmul.msk.bf16.vlgmr.msrb.gmra.mxu0 %vm640_vm0, %v842_v22 }
 0x536   : > { %v875_v24 = vpop.f32.mrf.mxu0 }
 0x537   : > { %v876_v25 = vadd.f32 %v1799_v23, %v875_v24 }
 0x539   : > { %v879_v26 = vadd.f32 %v876_v25, %v2053_v30  ;;  %v1760_v30 = vld [vmem:[%s2284_s12] sm:$0xff] }
 0x53a   : > { %943 = vmatpush.bf16.msrb.mxu1 %v1760_v30 }
 0x53b   : > { %v882_v27 = vsel %vm640_vm0, %v879_v26, 0.0 }
 0x53c   : > { %883 = vadd.xlane.f32.xlu2 %v882_v27 }
 0x53e   : > { %v877_v28 = vpop.f32.mrf.mxu0 }
 0x5af   : > { %v884_v29 = vpop.xlane.xlu2 %883 }
 0x5b0   : > { %v885_v31 = vmul.f32 %v884_v29, %v2036_v8 }
 0x5b2   : > { %v886_v32 = vsub.f32 %v879_v26, %v885_v31  ;;  %v1804_v31 = vld [vmem:[%s2314_s22] ss:$0 sm:$0xff] }
 0x5b4   : > { %v887_v33 = vmul.f32 %v886_v32, %v886_v32 }
 0x5b6   : > { %v888_v34 = vsel %vm640_vm0, %v887_v33, 0.0  ;;  %v1805_v33 = vld [vmem:[%s2289_s17] ss:$0 sm:$0xff] }
 0x5b7   : > { %889 = vadd.xlane.f32.xlu1 %v888_v34 }
 0x62a   : > { %v890_v36 = vpop.xlane.xlu1 %889 }
 0x62b   : > { %v891_v37 = vmul.f32 %v890_v36, %v2036_v8 }
 0x62d   : > { %v892_v38 = vadd.f32 1e-12, %v891_v37  ;;  %v1806_v37 = vld [vmem:[%s2279_s7 + $0x1] ss:$0 sm:$0xff] }
 0x62f   : > { %1827 = vrsqrt.f32 %v892_v38  ;;  %vm899_vm9 = vweird.f32 %v892_v38 }
 0x635   : > { %v1828_v39 = vpop.eup %1827 }
 0x636   : > { %v894_v40 = vmul.f32 %v1828_v39, %v892_v38  ;;  %vm900_vm8 = vweird.f32 %v1828_v39 }
 0x637   : > { %vm901_vm10 = vmor %vm899_vm9, %vm900_vm8  ;;  %vm1453_vm8 = vcmask 7168  }
 0x638   : > { %v895_v41 = vmul.f32 %v1828_v39, %v894_v40 }
 0x63a   : > { %v896_v42 = vmul.f32 0.5, %v895_v41 }
 0x63c   : > { %v897_v43 = vsub.f32 1.5, %v896_v42 }
 0x63e   : > { %v898_v44 = vmul.f32 %v1828_v39, %v897_v43 }
 0x640   : > { %v902_v47 = vsel %vm901_vm10, %v1828_v39, %v898_v44  ;;  %vm1525_vm10 = vcmask 0  }
 0x641   : > { %v903_v48 = vmul.f32 %v902_v47, %v886_v32 }
 0x643   : > { %v907_v50 = vmul.f32 %v1800_v45, %v903_v48 }
 0x645   : > { %v911_v51 = vadd.f32 %v1801_v49, %v907_v50 }
 0x647   : > { %v912_v52 = vpack.c.bf16 %v911_v51, %v911_v51 }
 0x649   : > { %1651 = vmatmul.msk.bf16.vlgmr.msrb.gmra.mxu1 %vm640_vm0, %v912_v52 }
 0x6c6   : > { %v945_v58 = vpop.f32.mrf.mxu1 }
 0x6c7   : > { %v946_v59 = vadd.f32 %v1802_v57, %v945_v58 }
 0x6c9   : > { %v950_v60 = vmul.f32 0.044715, %v946_v59  ;;  %v949_v3 = vmul.f32 0.5, %v946_v59 }
 0x6cb   : > { %v951_v61 = vmul.f32 %v950_v60, %v946_v59 }
 0x6cd   : > { %v952_v62 = vmul.f32 %v951_v61, %v946_v59 }
 0x6ce   : > { %v947_v63 = vpop.f32.mrf.mxu1 }
 0x6cf   : > { %v953_v0 = vadd.f32 %v952_v62, %v946_v59 }
 0x6d1   : > { %v954_v1 = vmul.f32 0.7978846, %v953_v0 }
 0x6d3   : > { %1829 = vtanh.f32 %v954_v1 }
 0x6d9   : > { %v1830_v2 = vpop.eup %1829 }
 0x6da   : > { %v956_v4 = vadd.f32 1.0, %v1830_v2 }
 0x6dc   : > { %v957_v5 = vmul.f32 %v956_v4, %v949_v3 }
 0x6de   : > { %v958_v6 = vpack.c.bf16 %v957_v5, %v957_v5 }
 0x6e0   : > { %1668 = vmatmul.msk.bf16.vlgmr.msrb.gmra.mxu3 %vm995_vm11, %v958_v6 }
 0x763   : > { %v1008_v9 = vpop.f32.mrf.mxu3 }
 0x764   : > { %v1009_v10 = vadd.f32 %v1803_v7, %v1008_v9 }
 0x766   : > { %v1012_v11 = vadd.f32 %v1009_v10, %v911_v51 }
 0x768   : > { %v1015_v12 = vsel %vm640_vm0, %v1012_v11, 0.0 }
 0x769   : > { %1016 = vadd.xlane.f32.xlu0 %v1015_v12 }
 0x76b   : > { %v1010_v13 = vpop.f32.mrf.mxu3 }
 0x7dc   : > { %v1017_v14 = vpop.xlane.xlu0 %1016 }
 0x7dd   : > { %v1018_v15 = vmul.f32 %v1017_v14, %v2036_v8  ;;  %v1769_v14 = vld [vmem:[%s2280_s8 + $0x18] sm:$0xff] }
 0x7df   : > { %v1019_v16 = vsub.f32 %v1012_v11, %v1018_v15 }
 0x7e1   : > { %v1020_v17 = vmul.f32 %v1019_v16, %v1019_v16 }
 0x7e3   : > { %v1021_v18 = vsel %vm640_vm0, %v1020_v17, 0.0 }
 0x7e4   : > { %1022 = vadd.xlane.f32.xlu0 %v1021_v18 }
 0x857   : > { %v1023_v21 = vpop.xlane.xlu0 %1022 }
 0x858   : > { %v1024_v22 = vmul.f32 %v1023_v21, %v2036_v8 }
 0x85a   : > { %v1025_v23 = vadd.f32 1e-12, %v1024_v22 }
 0x85c   : > { %1831 = vrsqrt.f32 %v1025_v23  ;;  %vm1032_vm13 = vweird.f32 %v1025_v23 }
 0x862   : > { %v1832_v24 = vpop.eup %1831 }
 0x863   : > { %v1027_v25 = vmul.f32 %v1832_v24, %v1025_v23  ;;  %vm1033_vm12 = vweird.f32 %v1832_v24  ;;  %v1807_v23 = vld [vmem:[%s2281_s9 + $0x1] ss:$0 sm:$0xff] }
 0x864   : > { %vm1034_vm14 = vmor %vm1032_vm13, %vm1033_vm12 }
 0x865   : > { %v1028_v26 = vmul.f32 %v1832_v24, %v1027_v25 }
 0x867   : > { %v1029_v27 = vmul.f32 0.5, %v1028_v26 }
 0x869   : > { %v1030_v28 = vsub.f32 1.5, %v1029_v27 }
 0x86b   : > { %v1031_v29 = vmul.f32 %v1832_v24, %v1030_v28 }
 0x86d   : > { %v1035_v32 = vsel %vm1034_vm14, %v1832_v24, %v1031_v29 }
 0x86e   : > { %v1036_v34 = vmul.f32 %v1035_v32, %v1019_v16 }
 0x870   : > { %v1040_v35 = vmul.f32 %v1804_v31, %v1036_v34 }
 0x872   : > { %v2151_v30 = vadd.f32 %v1805_v33, %v1040_v35  ;;  %v1771_v35 = vld [vmem:[%s2284_s12 + $0x18] sm:$0xff] }
 0x874   : > { %v1045_v36 = vpack.c.bf16 %v2151_v30, %v2151_v30 }
 0x876   : > { %1682 = vmatmul.msk.bf16.vlgmr.msra.gmra.mxu2 %vm640_vm0, %v1045_v36 }
 0x8f9   : > { %v1080_v38 = vpop.f32.mrf.mxu2 }
 0x8fa   : > { %v1081_v39 = vadd.f32 %v1806_v37, %v1080_v38 }
 0x8fc   : > { %v1084_v40 = vpack.c.bf16 %v1081_v39, %v1081_v39 }
 0x8fe   : > { %1140 = vrot.lane.b32.xlu2 %v1084_v40, %s1892_s24  ;;  %1142 = vrot.lane.b32.xlu0 %v1084_v40, %s1894_s26 }
 0x901   : > { %v1082_v41 = vpop.f32.mrf.mxu2 }
 0x906   : > { %1175 = vrot.lane.b32.xlu2 %v1084_v40, %s1895_s0  ;;  %1086 = vrot.lane.b32.xlu0 %v1084_v40, %s2315_s2  ;;  %s2317_s0 = smov 16  }
 0x90e   : > { %1119 = vrot.lane.b32.xlu2 %v1084_v40, %s2316_s27  ;;  %s1452_s27 = sld [smem:[#allocation3 + %s2021_s1]]  ;;  %s1898_s1 = smov 127  }
 0x958   : > { %v1141_v42 = vpop.permute.xlu2 %1140 }
 0x960   : > { %v1176_v43 = vpop.permute.xlu2 %1175 }
 0x961   : > { %v1181_v44 = vsel %vm764_vm7, %v1176_v43, 0 }
 0x962   : > { %1190 = vmatpush.bf16.msrb.mxu2 %v1181_v44 }
 0x968   : > { %v1120_v45 = vpop.permute.xlu2 %1119 }
 0x969   : > { %v1125_v47 = vsel %vm764_vm7, %v1120_v45, 0  ;;  %v1808_v45 = vld [vmem:[%s2282_s10 + $0x1] ss:$0 sm:$0xff]  ;;  %vm1488_vm7 = vcmask 15368  }
 0x96a   : > { %1134 = vmatpush.bf16.msra.mxu1 %v1125_v47 }
 0x96e   : > { %1307 = vmatpush.bf16.msrb.mxu1 %v1771_v35 }
 0x970   : > { %v1143_v48 = vpop.permute.xlu0 %1142 }
 0x971   : > { %v1148_v49 = vsel %vm726_vm5, %v1143_v48, 0  ;;  %v1809_v48 = vld [vmem:[%s2283_s11 + $0x1] ss:$0 sm:$0xff] }
 0x972   : > { %1157 = vmatpush.bf16.xpose.msra.mxu3 %v1148_v49 }
 0x978   : > { %v1087_v50 = vpop.permute.xlu0 %1086 }
 0x979   : > { %v1092_v51 = vsel %vm726_vm5, %v1087_v50, 0  ;;  %1685 = vmatmul.msk.bf16.vlgmr.msra.gmra.mxu3 %vm726_vm5, %v1141_v42 }
 0x97a   : > { %1101 = vmatpush.bf16.xpose.msra.mxu0 %v1092_v51 }
 0x981   : > { %1683 = vmatmul.msk.bf16.vlgmr.msra.gmra.mxu0 %vm726_vm5, %v1084_v40 }
 0x982   : > { %1233 = vmatpush.bf16.msrb.mxu0 %v1769_v14 }
 0x986   : > { %1234 = vmatpush.bf16.msrb.mxu0 %v1768_v19  ;;  %v1776_v19 = vld [vmem:[%s2290_s18] sm:$0xff] }
 0x9fc   : > { %v1159_v52 = vpop.f32.mrf.mxu3 }
 0x9fd   : > { %v1160_v53 = vadd.f32 %v1159_v52, %v2072_v46 }
 0x9fe   : > { %v1103_v54 = vpop.f32.mrf.mxu0 }
 0x9ff   : > { %v1104_v55 = vadd.f32 %v1103_v54, %v2072_v46  ;;  %v1163_v56 = vsel %vm746_vm6, %v1160_v53, -inf  ;;  %v1774_v54 = vld [vmem:[%s2286_s14 + $0x30] sm:$0xff] }
 0xa00   : > { %1164 = vmax.xlane.f32.xlu1 %v1163_v56  ;;  %v1772_v56 = vld [vmem:[%s2286_s14 + $0x20] sm:$0xff] }
 0xa01   : > { %v1107_v57 = vsel %vm746_vm6, %v1104_v55, -inf }
 0xa02   : > { %1108 = vmax.xlane.f32.xlu0 %v1107_v57  ;;  %v1810_v57 = vld [vmem:[%s2285_s13 + $0x1] ss:$0 sm:$0xff] }
 0xa04   : > { %v1161_v58 = vpop.f32.mrf.mxu3 }
 0xa06   : > { %v1105_v59 = vpop.f32.mrf.mxu0 }
 0xa73   : > { %v1165_v60 = vpop.xlane.xlu1 %1164 }
 0xa74   : > { %v1166_v61 = vsub.f32 %v1160_v53, %v1165_v60  ;;  %v1775_v53 = vld [vmem:[%s2286_s14 + $0x38] sm:$0xff] }
 0xa75   : > { %v1109_v62 = vpop.xlane.xlu0 %1108  ;;  %1369 = vmatpush.bf16.msrb.mxu3 %v1775_v53 }
 0xa76   : > { %v1167_v63 = vmul.f32 1.442695, %v1166_v61  ;;  %v1110_v0 = vsub.f32 %v1104_v55, %v1109_v62  ;;  %v1773_v55 = vld [vmem:[%s2286_s14 + $0x28] sm:$0xff] }
 0xa78   : > { %1833 = vpow2.f32 %v1167_v63  ;;  %v1111_v1 = vmul.f32 1.442695, %v1110_v0 }
 0xa79   : > { %1370 = vmatpush.bf16.msrb.mxu3 %v1774_v54 }
 0xa7a   : > { %1835 = vpow2.f32 %v1111_v1 }
 0xa7d   : > { %1371 = vmatpush.bf16.msrb.mxu3 %v1773_v55 }
 0xa7e   : > { %v1834_v2 = vpop.eup %1833 }
 0xa7f   : > { %v1169_v3 = vsel %vm746_vm6, %v1834_v2, 0.0 }
 0xa80   : > { %1170 = vadd.xlane.f32.xlu1 %v1169_v3  ;;  %v1836_v46 = vpop.eup %1835 }
 0xa81   : > { %v1113_v4 = vsel %vm746_vm6, %v1836_v46, 0.0  ;;  %1372 = vmatpush.bf16.msrb.mxu3 %v1772_v56 }
 0xa88   : > { %1114 = vadd.xlane.f32.xlu1 %v1113_v4 }
 0xaf3   : > { %v1171_v5 = vpop.xlane.xlu1 %1170 }
 0xaf4   : > { %1837 = vrcp.f32 %v1171_v5 }
 0xafa   : > { %v1838_v6 = vpop.eup %1837 }
 0xafb   : > { %v1173_v7 = vmul.f32 %v1838_v6, %v1834_v2  ;;  %v1115_v9 = vpop.xlane.xlu1 %1114  ;;  %v1811_v6 = vld [vmem:[%s2287_s15 + $0x1] ss:$0 sm:$0xff] }
 0xafc   : > { %1839 = vrcp.f32 %v1115_v9 }
 0xafd   : > { %v1174_v10 = vpack.c.bf16 %v1173_v7, %v1173_v7 }
 0xaff   : > { %1686 = vmatmul.msk.bf16.vlgmr.msrb.gmra.mxu2 %vm746_vm6, %v1174_v10 }
 0xb02   : > { %v1840_v11 = vpop.eup %1839 }
 0xb03   : > { %v1117_v12 = vmul.f32 %v1840_v11, %v1836_v46 }
 0xb05   : > { %v1118_v13 = vpack.c.bf16 %v1117_v12, %v1117_v12 }
 0xb07   : > { %1684 = vmatmul.msk.bf16.vlgmr.msra.gmra.mxu1 %vm746_vm6, %v1118_v13  ;;  %vm1450_vm6 = vcmask 15360  }
 0xb82   : > { %v1192_v15 = vpop.f32.mrf.mxu2 }
 0xb83   : > { %1197 = vrot.lane.b32.xlu1 %v1192_v15, %s2317_s0  ;;  %s2318_s0 = sshll.u32 %s2027_s16, 3 }
 0xb84   : > { %v1136_v16 = vpop.f32.mrf.mxu1  ;;  %s632_s29 = scalar_lea.vmem %s2292_s20, %s2318_s0 }
 0xb8a   : > { %v1194_v17 = vpop.f32.mrf.mxu2 }
 0xb8c   : > { %v1138_v18 = vpop.f32.mrf.mxu1 }
 0xb8d   : > { %v1777_v18 = vld [vmem:[%s2290_s18 + $0x8] sm:$0xff] }
 0xb8e   : > { %1443 = vmatpush.bf16.msra.mxu2 %v1777_v18 }
 0xb92   : > { %1444 = vmatpush.bf16.msra.mxu2 %v1776_v19 }
 0xbf5   : > { %v1198_v20 = vpop.permute.xlu1 %1197 }
 0xbf6   : > { %v1200_v21 = vsel %vm726_vm5, %v1136_v16, %v1198_v20 }
 0xbf7   : > { %v1201_v22 = vpack.c.bf16 %v1200_v21, %v1200_v21 }
 0xbf9   : > { %1700 = vmatmul.msk.bf16.vlgmr.msrb.gmra.mxu0 %vm640_vm0, %v1201_v22 }
 0xc76   : > { %v1236_v24 = vpop.f32.mrf.mxu0 }
 0xc77   : > { %v1237_v25 = vadd.f32 %v1807_v23, %v1236_v24 }
 0xc79   : > { %v1240_v26 = vadd.f32 %v1237_v25, %v2151_v30  ;;  %v1770_v30 = vld [vmem:[%s2284_s12 + $0x10] sm:$0xff] }
 0xc7a   : > { %1308 = vmatpush.bf16.msrb.mxu1 %v1770_v30  ;;  %v1474_v30 = vlaneseq }
 0xc7b   : > { %v1245_v27 = vsel %vm640_vm0, %v1240_v26, 0.0 }
 0xc7c   : > { %1246 = vadd.xlane.f32.xlu2 %v1245_v27 }
 0xc7e   : > { %v1238_v28 = vpop.f32.mrf.mxu0 }
 0xcef   : > { %v1247_v29 = vpop.xlane.xlu2 %1246 }
 0xcf0   : > { %v1248_v31 = vmul.f32 %v1247_v29, %v2036_v8  ;;  %v1812_v29 = vld [vmem:[%s2314_s22 + $0x1] ss:$0 sm:$0xff] }
 0xcf2   : > { %v1249_v32 = vsub.f32 %v1240_v26, %v1248_v31 }
 0xcf4   : > { %v1250_v33 = vmul.f32 %v1249_v32, %v1249_v32 }
 0xcf6   : > { %v1251_v34 = vsel %vm640_vm0, %v1250_v33, 0.0 }
 0xcf7   : > { %1252 = vadd.xlane.f32.xlu0 %v1251_v34 }
 0xd6a   : > { %v1253_v36 = vpop.xlane.xlu0 %1252 }
 0xd6b   : > { %v1254_v37 = vmul.f32 %v1253_v36, %v2036_v8  ;;  %v1475_v36 = vshrl.u32 %v1474_v30, 7 }
 0xd6d   : > { %v1255_v38 = vadd.f32 1e-12, %v1254_v37  ;;  %v1814_v37 = vld [vmem:[%s2291_s19] ss:$0 sm:$0xff] }
 0xd6f   : > { %1841 = vrsqrt.f32 %v1255_v38  ;;  %vm1262_vm1 = vweird.f32 %v1255_v38 }
 0xd75   : > { %v1842_v39 = vpop.eup %1841 }
 0xd76   : > { %v1257_v40 = vmul.f32 %v1842_v39, %v1255_v38  ;;  %vm1263_vm15 = vweird.f32 %v1842_v39  ;;  %v1476_v38 = vstv %s1452_s27 }
 0xd77   : > { %vm1264_vm2 = vmor %vm1262_vm1, %vm1263_vm15  ;;  %vm2253_vm9 = vcmp.eq.s32.totalorder %v1475_v36, %v1476_v38 }
 0xd78   : > { %v1258_v41 = vmul.f32 %v1842_v39, %v1257_v40 }
 0xd7a   : > { %v1259_v42 = vmul.f32 0.5, %v1258_v41 }
 0xd7c   : > { %v1260_v43 = vsub.f32 1.5, %v1259_v42 }
 0xd7e   : > { %v1261_v44 = vmul.f32 %v1842_v39, %v1260_v43 }
 0xd80   : > { %v1265_v47 = vsel %vm1264_vm2, %v1842_v39, %v1261_v44 }
 0xd81   : > { %v1266_v49 = vmul.f32 %v1265_v47, %v1249_v32 }
 0xd83   : > { %v1270_v50 = vmul.f32 %v1808_v45, %v1266_v49 }
 0xd85   : > { %v1274_v51 = vadd.f32 %v1809_v48, %v1270_v50 }
 0xd87   : > { %v1275_v52 = vpack.c.bf16 %v1274_v51, %v1274_v51 }
 0xd89   : > { %1716 = vmatmul.msk.bf16.vlgmr.msrb.gmra.mxu1 %vm640_vm0, %v1275_v52 }
 0xe06   : > { %v1310_v58 = vpop.f32.mrf.mxu1 }
 0xe07   : > { %v1311_v59 = vadd.f32 %v1810_v57, %v1310_v58 }
 0xe09   : > { %v1315_v60 = vmul.f32 0.044715, %v1311_v59  ;;  %v1314_v3 = vmul.f32 0.5, %v1311_v59 }
 0xe0b   : > { %v1316_v61 = vmul.f32 %v1315_v60, %v1311_v59 }
 0xe0d   : > { %v1317_v62 = vmul.f32 %v1316_v61, %v1311_v59  ;;  %v1509_v61 = vstv %s1487_s23 }
 0xe0e   : > { %v1312_v63 = vpop.f32.mrf.mxu1 }
 0xe0f   : > { %v1318_v0 = vadd.f32 %v1317_v62, %v1311_v59 }
 0xe11   : > { %v1319_v1 = vmul.f32 0.7978846, %v1318_v0 }
 0xe13   : > { %1843 = vtanh.f32 %v1319_v1 }
 0xe19   : > { %v1844_v2 = vpop.eup %1843 }
 0xe1a   : > { %v1321_v46 = vadd.f32 1.0, %v1844_v2 }
 0xe1c   : > { %v1322_v4 = vmul.f32 %v1321_v46, %v1314_v3 }
 0xe1e   : > { %v1323_v5 = vpack.c.bf16 %v1322_v4, %v1322_v4 }
 0xe20   : > { %1742 = vmatmul.msk.bf16.vlgmr.msrb.gmra.mxu3 %vm995_vm11, %v1323_v5 }
 0xea3   : > { %v1374_v7 = vpop.f32.mrf.mxu3 }
 0xea4   : > { %v1375_v9 = vadd.f32 %v1811_v6, %v1374_v7 }
 0xea6   : > { %v1378_v10 = vadd.f32 %v1375_v9, %v1274_v51 }
 0xea8   : > { %v1383_v11 = vsel %vm640_vm0, %v1378_v10, 0.0 }
 0xea9   : > { %1384 = vadd.xlane.f32.xlu1 %v1383_v11 }
 0xeab   : > { %v1376_v12 = vpop.f32.mrf.mxu3 }
 0xf1c   : > { %v1385_v13 = vpop.xlane.xlu1 %1384 }
 0xf1d   : > { %v1386_v14 = vmul.f32 %v1385_v13, %v2036_v8 }
 0xf1f   : > { %v1387_v15 = vsub.f32 %v1378_v10, %v1386_v14 }
 0xf21   : > { %v1388_v16 = vmul.f32 %v1387_v15, %v1387_v15 }
 0xf23   : > { %v1389_v17 = vsel %vm640_vm0, %v1388_v16, 0.0 }
 0xf24   : > { %1390 = vadd.xlane.f32.xlu0 %v1389_v17 }
 0xf97   : > { %v1391_v20 = vpop.xlane.xlu0 %1390 }
 0xf98   : > { %v1392_v21 = vmul.f32 %v1391_v20, %v2036_v8  ;;  %v1813_v8 = vld [vmem:[%s2289_s17 + $0x1] ss:$0 sm:$0xff] }
 0xf9a   : > { %v1393_v22 = vadd.f32 1e-12, %v1392_v21 }
 0xf9c   : > { %1845 = vrsqrt.f32 %v1393_v22  ;;  %vm1400_vm4 = vweird.f32 %v1393_v22 }
 0xfa2   : > { %v1846_v23 = vpop.eup %1845 }
 0xfa3   : > { %v1395_v24 = vmul.f32 %v1846_v23, %v1393_v22  ;;  %vm1401_vm3 = vweird.f32 %v1846_v23 }
 0xfa4   : > { %vm1402_vm5 = vmor %vm1400_vm4, %vm1401_vm3 }
 0xfa5   : > { %v1396_v25 = vmul.f32 %v1846_v23, %v1395_v24 }
 0xfa7   : > { %v1397_v26 = vmul.f32 0.5, %v1396_v25 }
 0xfa9   : > { %v1398_v27 = vsub.f32 1.5, %v1397_v26 }
 0xfab   : > { %v1399_v28 = vmul.f32 %v1846_v23, %v1398_v27 }
 0xfad   : > { %v1403_v31 = vsel %vm1402_vm5, %v1846_v23, %v1399_v28 }
 0xfae   : > { %v1404_v32 = vmul.f32 %v1403_v31, %v1387_v15 }
 0xfb0   : > { %v1408_v33 = vmul.f32 %v1812_v29, %v1404_v32 }
 0xfb2   : > { %v1412_v34 = vadd.f32 %v1813_v8, %v1408_v33 }
 0xfb4   : > { %v1413_v35 = vpack.c.bf16 %v1412_v34, %v1412_v34 }
 0xfb6   : > { %1753 = vmatmul.msk.bf16.vlgmr.msra.gmra.mxu2 %vm640_vm0, %v1413_v35  ;;  %vm1510_vm0 = vcmp.eq.s32.totalorder %v1475_v36, %v1509_v61 }
0x1039   : > { %v1446_v39 = vpop.f32.mrf.mxu2 }
0x103a   : > { %v1447_v41 = vadd.f32 %v1814_v37, %v1446_v39 }
0x103c   : > { %1451 = vst.msk [vmem:[%s632_s29] sm:$0xff] %vm1450_vm6, %v1447_v41  ;;  %v1489_v42 = vsel %vm1488_vm7, %v1447_v41, -inf  ;;  %v1454_v43 = vsel %vm1453_vm8, %v1447_v41, -inf  ;;  %v1478_v44 = vsel %vm2253_vm9, %v1447_v41, 0.0  ;;  %v1511_v0 = vsel %vm1510_vm0, %v1447_v41, 0.0 }
0x103d   : > { %v1490_v45 = vrot.slane %v1489_v42, 4  ;;  %v1455_v47 = vrot.slane %v1454_v43, 4  ;;  %v1512_v2 = vsel %vm1488_vm7, %v1511_v0, 0.0  ;;  %v1479_v4 = vsel %vm1453_vm8, %v1478_v44, 0.0 }
0x103e   : > { %v1513_v7 = vrot.slane %v1512_v2, 4  ;;  %v1480_v11 = vrot.slane %v1479_v4, 4 }
0x103f   : > { %v1491_v48 = vmax.f32 %v1489_v42, %v1490_v45  ;;  %v1456_v49 = vmax.f32 %v1454_v43, %v1455_v47 }
0x1040   : > { %v1514_v14 = vadd.f32 %v1513_v7, %v1512_v2  ;;  %v1481_v17 = vadd.f32 %v1480_v11, %v1479_v4 }
0x1041   : > { %v1448_v50 = vpop.f32.mrf.mxu2  ;;  %v1492_v51 = vrot.slane %v1491_v48, 2  ;;  %v1457_v52 = vrot.slane %v1456_v49, 2 }
0x1042   : > { %v1515_v20 = vrot.slane %v1514_v14, 2  ;;  %v1482_v23 = vrot.slane %v1481_v17, 2 }
0x1043   : > { %v1493_v53 = vmax.f32 %v1491_v48, %v1492_v51  ;;  %v1458_v54 = vmax.f32 %v1456_v49, %v1457_v52 }
0x1044   : > { %v1516_v25 = vadd.f32 %v1515_v20, %v1514_v14  ;;  %v1483_v26 = vadd.f32 %v1482_v23, %v1481_v17 }
0x1045   : > { %v1494_v55 = vrot.slane %v1493_v53, 1  ;;  %v1459_v56 = vrot.slane %v1458_v54, 1 }
0x1046   : > { %v1517_v27 = vrot.slane %v1516_v25, 1  ;;  %v1484_v29 = vrot.slane %v1483_v26, 1 }
0x1047   : > { %v1495_v57 = vmax.f32 %v1493_v53, %v1494_v55  ;;  %v1460_v58 = vmax.f32 %v1458_v54, %v1459_v56 }
0x1048   : > { %v1518_v34 = vadd.f32 %v1517_v27, %v1516_v25  ;;  %v1485_v30 = vadd.f32 %v1484_v29, %v1483_v26 }
0x1049   : > { %v1496_v59 = vsub.f32 %v1447_v41, %v1495_v57  ;;  %v1461_v60 = vsub.f32 %v1447_v41, %v1460_v58 }
0x104b   : > { %v1497_v62 = vmul.f32 1.442695, %v1496_v59  ;;  %v1462_v63 = vmul.f32 1.442695, %v1461_v60 }
0x104d   : > { %1847 = vpow2.f32 %v1497_v62 }
0x104e   : > { %1849 = vpow2.f32 %v1462_v63 }
0x1053   : > { %v1848_v1 = vpop.eup %1847 }
0x1054   : > { %v1850_v3 = vpop.eup %1849  ;;  %v1499_v46 = vsel %vm1488_vm7, %v1848_v1, 0.0 }
0x1055   : > { %v1500_v5 = vrot.slane %v1499_v46, 4  ;;  %v1464_v6 = vsel %vm1453_vm8, %v1850_v3, 0.0 }
0x1056   : > { %v1465_v9 = vrot.slane %v1464_v6, 4 }
0x1057   : > { %v1501_v10 = vadd.f32 %v1500_v5, %v1499_v46 }
0x1058   : > { %v1466_v12 = vadd.f32 %v1465_v9, %v1464_v6 }
0x1059   : > { %v1502_v13 = vrot.slane %v1501_v10, 2 }
0x105a   : > { %v1467_v15 = vrot.slane %v1466_v12, 2 }
0x105b   : > { %v1503_v16 = vadd.f32 %v1502_v13, %v1501_v10 }
0x105c   : > { %v1468_v18 = vadd.f32 %v1467_v15, %v1466_v12 }
0x105d   : > { %v1504_v19 = vrot.slane %v1503_v16, 1 }
0x105e   : > { %v1469_v21 = vrot.slane %v1468_v18, 1 }
0x105f   : > { %v1505_v22 = vadd.f32 %v1504_v19, %v1503_v16 }
0x1060   : > { %v1470_v24 = vadd.f32 %v1469_v21, %v1468_v18 }
0x1061   : > { %1851 = vlog2.f32 %v1505_v22 }
0x1062   : > { %1853 = vlog2.f32 %v1470_v24 }
0x1067   : > { %v1852_v28 = vpop.eup %1851 }
0x1068   : > { %v1854_v31 = vpop.eup %1853  ;;  %v1507_v32 = vmul.f32 0.6931472, %v1852_v28 }
0x1069   : > { %v1472_v8 = vmul.f32 0.6931472, %v1854_v31 }
0x106a   : > { %v1508_v33 = vadd.f32 %v1507_v32, %v1495_v57 }
0x106b   : > { %v1473_v35 = vadd.f32 %v1472_v8, %v1460_v58 }
0x106c   : > { %v1519_v36 = vsub.f32 %v1508_v33, %v1518_v34 }
0x106d   : > { %v1486_v37 = vsub.f32 %v1473_v35, %v1485_v30 }
0x106e   : > { %1521 = vrot.lane.b32.xlu0 %v1519_v36, %s1898_s1 }
0x10e0   : > { %v1522_v38 = vpop.permute.xlu0 %1521 }
0x10e1   : > { %v1524_v39 = vadd.f32 %v1522_v38, %v1486_v37 }
0x10e3   : > { %1526 = vst.msk [vmem:[%s635_s6] sm:$0x1] %vm1525_vm10, %v1524_v39 }
0x10e4 PF: > { %s45_s5 = sadd.s32 1, %s1887_s5  }
0x10e5   : > { %p42_p4 = scmp.ge.s32.totalorder %s45_s5, 4  }
0x10e7   :  { %44 = sbr.rel (!%p42_p4) target bundleno = 21 (0x15), region = 149 }

</bundles_post_ra>
